<compile_context>
chip_gen: v6e
topology: v6e:2x2x1
jax: 0.10.0
libtpu: 0.0.40
codegen_flags: <defaults>
</compile_context>

<pallas_src>
import math
import functools

import jax
import jax.numpy as jnp
from jax import lax
from jax.experimental import pallas as pl
from jax.experimental.pallas import tpu as pltpu


def _vmem_limit_bytes():
    # Generation-aware VMEM cap: ~78% of physical, capped at 100 MiB
    # (v5e/v6e: 128 MiB -> 100 MiB; v7x: 64 MiB -> ~50 MiB). Safe fallback if query fails.
    try:
        cap = pltpu.get_tpu_info().vmem_capacity_bytes
    except Exception:
        cap = 64 * 1024 * 1024
    return int(min(cap * 0.78, 100 * 1024 * 1024))


def _rmsnorm(x, w, eps=1e-5):
    # x: (T, D) f32, w: (D,) f32  -- rsqrt (EUP) instead of sqrt + divide (VALU)
    inv = lax.rsqrt(jnp.mean(x * x, axis=-1, keepdims=True) + eps)
    return w * (x * inv)


def _gelu_tanh(x):
    # tanh-approximate GELU: single EUP tanh, negligible diff vs exact erf at bf16 tolerance
    c = math.sqrt(2.0 / math.pi)
    return 0.5 * x * (1.0 + jnp.tanh(c * (x + 0.044715 * x * x * x)))


# ---------------------------------------------------------------------------
# Kernel 1: pre-norm + fused QKV projection (scale pre-folded into Wq columns)
#   grid = (B, num_row_tiles); single lane-dense (row, 3D) bf16 output store
# ---------------------------------------------------------------------------
def qkv_proj_kernel(x_ref, g1_ref, wqkv_ref, qkv_ref):
    x = x_ref[0].astype(jnp.float32)                                  # (Tr, D)
    h = _rmsnorm(x, g1_ref[0].astype(jnp.float32)).astype(jnp.bfloat16)
    qkv_ref[0] = jnp.dot(h, wqkv_ref[...],
                         preferred_element_type=jnp.float32).astype(qkv_ref.dtype)


# ---------------------------------------------------------------------------
# Kernel 2: flash-style causal attention + output projection + residual
#   grid = (B, n_tri_tiles) where the second axis enumerates only the lower-triangular
#   (iq, ik) tile pairs via scalar-prefetched tables (no wasted grid steps).
#   Per-head score blocks; lane-dense (Tq, D) f32 accumulator; mask only on diagonal tiles.
# ---------------------------------------------------------------------------
def attn_kernel(iq_tab_ref, ik_tab_ref, x_ref, q_ref, k_ref, v_ref, wo_ref, o_ref,
                m_sc, l_sc, acc_sc, *, n_heads):
    t = pl.program_id(1)
    iq = iq_tab_ref[t]
    ik = ik_tab_ref[t]

    tq = q_ref.shape[1]
    tk = k_ref.shape[1]
    d = q_ref.shape[2]
    dh = d // n_heads

    @pl.when(ik == 0)
    def _init():
        m_sc[...] = jnp.full_like(m_sc, -jnp.inf)
        l_sc[...] = jnp.zeros_like(l_sc)
        acc_sc[...] = jnp.zeros_like(acc_sc)

    def _accumulate(masked):
        if masked:
            # Only diagonal tiles need the causal mask (iq*tq == ik*tk since tq == tk).
            row = lax.broadcasted_iota(jnp.int32, (tq, tk), 0)
            col = lax.broadcasted_iota(jnp.int32, (tq, tk), 1)
            keep = col <= row
        for h in range(n_heads):                      # small static unroll over heads
            lo, hi = h * dh, (h + 1) * dh
            qh = q_ref[0, :, lo:hi]                   # (Tq, dh) bf16, scale pre-folded
            kh = k_ref[0, :, lo:hi]                   # (Tk, dh) bf16
            vh = v_ref[0, :, lo:hi]                   # (Tk, dh) bf16
            s = lax.dot_general(qh, kh, (((1,), (1,)), ((), ())),
                                preferred_element_type=jnp.float32)   # (Tq, Tk) f32
            if masked:
                s = jnp.where(keep, s, -jnp.inf)      # diagonal always unmasked -> no NaN rows
            m_prev = m_sc[h]                          # (Tq, 1)
            m_new = jnp.maximum(m_prev, jnp.max(s, axis=-1, keepdims=True))
            alpha = jnp.exp(m_prev - m_new)
            p = jnp.exp(s - m_new)                    # (Tq, Tk) f32
            l_sc[h] = alpha * l_sc[h] + jnp.sum(p, axis=-1, keepdims=True)
            acc_sc[:, lo:hi] = alpha * acc_sc[:, lo:hi] + jnp.dot(
                p.astype(jnp.bfloat16), vh, preferred_element_type=jnp.float32)
            m_sc[h] = m_new

    @pl.when(ik < iq)
    def _interior():
        _accumulate(masked=False)

    # The diagonal tile is the last contributing kv tile for this query tile -> finalize.
    @pl.when(ik == iq)
    def _diag_and_finalize():
        _accumulate(masked=True)
        for h in range(n_heads):
            lo, hi = h * dh, (h + 1) * dh
            acc_sc[:, lo:hi] = acc_sc[:, lo:hi] * pl.reciprocal(l_sc[h], approx=True)
        attn = acc_sc[...].astype(jnp.bfloat16)                       # (Tq, D), no transpose
        proj = jnp.dot(attn, wo_ref[...], preferred_element_type=jnp.float32)
        # attention-weight dropout(p=0.1) is identity at inference
        o_ref[0] = (x_ref[0].astype(jnp.float32) + proj).astype(o_ref.dtype)


# ---------------------------------------------------------------------------
# Kernel 3: MLP with the 4*D hidden dim K-tiled (innermost "arbitrary" axis), residual fused
#   grid = (B, num_row_tiles, num_hidden_tiles)
# ---------------------------------------------------------------------------
def mlp_kernel(x1_ref, g2_ref, w1_ref, b1_ref, w2_ref, b2_ref, o_ref,
               h2_sc, acc_sc):
    fi = pl.program_id(2)

    @pl.when(fi == 0)
    def _init():
        x1 = x1_ref[0].astype(jnp.float32)
        h2_sc[...] = _rmsnorm(x1, g2_ref[0].astype(jnp.float32)).astype(h2_sc.dtype)
        acc_sc[...] = jnp.zeros_like(acc_sc)

    ff = jnp.dot(h2_sc[...], w1_ref[...],
                 preferred_element_type=jnp.float32) + b1_ref[0].astype(jnp.float32)
    ff = _gelu_tanh(ff)
    acc_sc[...] += jnp.dot(ff.astype(jnp.bfloat16), w2_ref[...],
                           preferred_element_type=jnp.float32)

    @pl.when(fi == pl.num_programs(2) - 1)
    def _finalize():
        out = x1_ref[0].astype(jnp.float32) + acc_sc[...] + b2_ref[0].astype(jnp.float32)
        # MLP dropout(p=0.1) is identity at inference
        o_ref[0] = out.astype(o_ref.dtype)


# ---------------------------------------------------------------------------
# Wrapper
# ---------------------------------------------------------------------------
def transformer_block(x, params, n_heads, *, q_block=None, kv_block=None,
                      row_block=None, f_block=None, single_buffer_weights=True):
    B, T, D = x.shape
    F = params["w1"].shape[1]
    assert D % n_heads == 0
    assert D % 128 == 0, "keep D lane-dense (multiple of 128)"
    dh = D // n_heads

    def _pick(extent, preferred):
        for p in preferred:
            if extent % p == 0:
                return p
        return extent

    # Bigger tiles on v6e/v7x (256-wide MXU, fewer grid steps); still fine on v5e.
    if row_block is None:
        row_block = _pick(T, (256, 128))
    if q_block is None:
        q_block = _pick(T, (256, 128))
    if kv_block is None:
        kv_block = q_block
    if f_block is None:
        f_block = _pick(F, (512, 256, 128))

    assert q_block == kv_block, "causal diagonal-tile logic assumes square attention tiles"
    assert T % q_block == 0 and T % row_block == 0 and F % f_block == 0

    bf16 = jnp.bfloat16
    scale = 1.0 / math.sqrt(dh)
    # Fused QKV weight, 1/sqrt(dh) folded into the Wq columns (one-time param transform).
    wqkv = jnp.concatenate(
        [params["wq"] * scale, params["wk"], params["wv"]], axis=1).astype(bf16)
    wo = params["wo"].astype(bf16)
    w1 = params["w1"].astype(bf16)
    w2 = params["w2"].astype(bf16)
    g1, g2, b1, b2 = params["g1"], params["g2"], params["b1"], params["b2"]

    vmem = _vmem_limit_bytes()

    def _invariant(shape, index_map):
        # Grid-invariant weights don't need double-buffering.
        if single_buffer_weights:
            return pl.BlockSpec(shape, index_map, pipeline_mode=pl.Buffered(1))
        return pl.BlockSpec(shape, index_map)

    nr = T // row_block
    nq = T // q_block
    nf = F // f_block

    # ---- 1) pre-norm + fused QKV projection ----
    qkv = pl.pallas_call(
        qkv_proj_kernel,
        out_shape=jax.ShapeDtypeStruct((B, T, 3 * D), bf16),
        grid_spec=pltpu.PrefetchScalarGridSpec(
            num_scalar_prefetch=0,
            grid=(B, nr),
            in_specs=[
                pl.BlockSpec((1, row_block, D), lambda b, i: (b, i, 0)),   # x
                pl.BlockSpec((1, D), lambda b, i: (0, 0)),                 # g1
                _invariant((D, 3 * D), lambda b, i: (0, 0)),               # fused Wqkv
            ],
            out_specs=pl.BlockSpec((1, row_block, 3 * D), lambda b, i: (b, i, 0)),
        ),
        compiler_params=pltpu.CompilerParams(
            dimension_semantics=("parallel", "parallel"),
            vmem_limit_bytes=vmem),
    )(x, g1, wqkv)

    # ---- 2) flash-style causal attention over a flattened lower-triangular grid ----
    iq_list, ik_list = [], []
    for i in range(nq):
        for j in range(i + 1):
            iq_list.append(i)
            ik_list.append(j)
    iq_tab = jnp.asarray(iq_list, jnp.int32)
    ik_tab = jnp.asarray(ik_list, jnp.int32)
    n_tiles = len(iq_list)                       # nq*(nq+1)//2

    # NOTE: the flattened (iq, ik) axis carries the kv reduction -> must be "arbitrary"
    # and innermost; the scratch init/finalize gating depends on that ordering.
    x1 = pl.pallas_call(
        functools.partial(attn_kernel, n_heads=n_heads),
        out_shape=jax.ShapeDtypeStruct((B, T, D), bf16),
        grid_spec=pltpu.PrefetchScalarGridSpec(
            num_scalar_prefetch=2,
            grid=(B, n_tiles),
            in_specs=[
                pl.BlockSpec((1, q_block, D), lambda b, t, iq, ik: (b, iq[t], 0)),   # x (residual)
                pl.BlockSpec((1, q_block, D), lambda b, t, iq, ik: (b, iq[t], 0)),   # q view of qkv
                pl.BlockSpec((1, kv_block, D), lambda b, t, iq, ik: (b, ik[t], 1)),  # k view
                pl.BlockSpec((1, kv_block, D), lambda b, t, iq, ik: (b, ik[t], 2)),  # v view
                _invariant((D, D), lambda b, t, iq, ik: (0, 0)),                     # wo
            ],
            out_specs=pl.BlockSpec((1, q_block, D), lambda b, t, iq, ik: (b, iq[t], 0)),
            scratch_shapes=[
                pltpu.VMEM((n_heads, q_block, 1), jnp.float32),   # running max m (per head)
                pltpu.VMEM((n_heads, q_block, 1), jnp.float32),   # running sum l (per head)
                pltpu.VMEM((q_block, D), jnp.float32),            # lane-dense output accumulator
            ]),
        compiler_params=pltpu.CompilerParams(
            dimension_semantics=("parallel", "arbitrary"),
            vmem_limit_bytes=vmem),
    )(iq_tab, ik_tab, x, qkv, qkv, qkv, wo)

    # ---- 3) MLP with K-tiled hidden dim + residual ----
    out = pl.pallas_call(
        mlp_kernel,
        out_shape=jax.ShapeDtypeStruct((B, T, D), x.dtype),
        grid_spec=pltpu.PrefetchScalarGridSpec(
            num_scalar_prefetch=0,
            grid=(B, nr, nf),
            in_specs=[
                pl.BlockSpec((1, row_block, D), lambda b, i, f: (b, i, 0)),  # x1 (bf16)
                pl.BlockSpec((1, D), lambda b, i, f: (0, 0)),                # g2
                pl.BlockSpec((D, f_block), lambda b, i, f: (0, f)),          # W1 hidden-tile
                pl.BlockSpec((1, f_block), lambda b, i, f: (0, f)),          # b1 hidden-tile
                pl.BlockSpec((f_block, D), lambda b, i, f: (f, 0)),          # W2 hidden-tile
                pl.BlockSpec((1, D), lambda b, i, f: (0, 0)),                # b2
            ],
            out_specs=pl.BlockSpec((1, row_block, D), lambda b, i, f: (b, i, 0)),
            scratch_shapes=[
                pltpu.VMEM((row_block, D), jnp.bfloat16),   # cached normalized h2
                pltpu.VMEM((row_block, D), jnp.float32),    # f32 accumulator
            ]),
        compiler_params=pltpu.CompilerParams(
            dimension_semantics=("parallel", "parallel", "arbitrary"),
            vmem_limit_bytes=vmem),
    )(x1, g2, w1, b1, w2, b2)

    return out


# ---------------------------------------------------------------------------
# Pure-JAX f32 reference replicating the PyTorch forward (dropout = identity)
# ---------------------------------------------------------------------------
def reference_block(x, params, n_heads):
    B, T, D = x.shape
    dh = D // n_heads

    def rms(v, w):
        n = jnp.sqrt(jnp.mean(v * v, axis=-1, keepdims=True) + 1e-5)
        return w * (v / n)

    h = rms(x, params["g1"][0])
    q = (h @ params["wq"]).reshape(B, T, n_heads, dh).transpose(0, 2, 1, 3)
    k = (h @ params["wk"]).reshape(B, T, n_heads, dh).transpose(0, 2, 1, 3)
    v = (h @ params["wv"]).reshape(B, T, n_heads, dh).transpose(0, 2, 1, 3)
    scores = jnp.einsum('bhqd,bhkd->bhqk', q, k) / math.sqrt(dh)
    mask = jnp.tril(jnp.ones((T, T)))[None, None]
    scores = jnp.where(mask == 0, -jnp.inf, scores)
    attn_w = jax.nn.softmax(scores, axis=-1)
    attn = jnp.einsum('bhqk,bhkd->bhqd', attn_w, v).transpose(0, 2, 1, 3).reshape(B, T, D)
    x1 = x + attn @ params["wo"]

    h2 = rms(x1, params["g2"][0])
    ff = h2 @ params["w1"] + params["b1"][0]
    ff = 0.5 * ff * (1.0 + lax.erf(ff / math.sqrt(2.0)))
    ff = ff @ params["w2"] + params["b2"][0]
    return x1 + ff


if __name__ == "__main__":
    # Lane-dense sizes (multiples of 128); explicit 128-blocks so the triangular tiling
    # (nq=2 -> 3 tile-pairs) and the MLP K-tiling (nf=4) multi-tile paths are exercised.
    B, T, D, H = 2, 256, 128, 4

    key = jax.random.PRNGKey(0)
    keys = jax.random.split(key, 10)
    init = lambda k, shape, s=0.05: (jax.random.normal(k, shape, jnp.float32) * s)

    params = {
        "wq": init(keys[0], (D, D)),
        "wk": init(keys[1], (D, D)),
        "wv": init(keys[2], (D, D)),
        "wo": init(keys[3], (D, D)),
        "g1": jnp.ones((1, D), jnp.float32),      # RMSNorm init = ones
        "g2": jnp.ones((1, D), jnp.float32),
        "w1": init(keys[4], (D, 4 * D)),
        "b1": init(keys[5], (1, 4 * D)),
        "w2": init(keys[6], (4 * D, D)),
        "b2": init(keys[7], (1, D)),
    }

    x = jax.random.normal(keys[8], (B, T, D), jnp.float32)
    kwargs = dict(q_block=128, kv_block=128, row_block=128, f_block=128)

    try:
        out = jax.block_until_ready(transformer_block(x, params, n_heads=H, **kwargs))
    except Exception:
        # Compatibility fallback: if pipeline_mode=pl.Buffered(1) single-buffering is not
        # supported by this JAX/Pallas build, rerun with default double-buffered weights.
        out = jax.block_until_ready(
            transformer_block(x, params, n_heads=H, single_buffer_weights=False, **kwargs))

    ref = reference_block(x, params, n_heads=H)
    assert out.shape == (B, T, D)
    # Tolerance covers bf16 MXU operands, bf16 inter-kernel activations, approx reciprocal
    # and tanh-GELU vs the exact-erf f32 reference.
    assert jnp.allclose(out, ref, atol=1e-1, rtol=1e-1), "mismatch vs JAX reference"

    print("KERNEL_OK")
</pallas_src>

<mosaic_0001>
module attributes {stable_mosaic.version = 11 : i64} {
  func.func @qkv_proj_kernel(%arg0: i32, %arg1: i32, %arg2: memref<1x128x128xf32, #tpu.memory_space<vmem>>, %arg3: memref<1x128xf32, #tpu.memory_space<vmem>>, %arg4: memref<128x384xbf16, #tpu.memory_space<vmem>>, %arg5: memref<1x128x384xbf16, #tpu.memory_space<vmem>>) attributes {dimension_semantics = [#tpu.dimension_semantics<parallel>, #tpu.dimension_semantics<parallel>], iteration_bounds = array<i64: 2, 2>, scalar_prefetch = 0 : i64, scratch_operands = 0 : i64, tpu.core_type = #tpu.core_type<tc>, window_params = [{transform_indices = @transform_0, window_bounds = array<i64: 1, 128, 128>}, {pipeline_mode = #tpu.pipeline_mode<synchronous>, transform_indices = @transform_1, window_bounds = array<i64: 1, 128>}, {pipeline_mode = #tpu.pipeline_mode<synchronous>, transform_indices = @transform_2, window_bounds = array<i64: 128, 384>}, {transform_indices = @transform_3, window_bounds = array<i64: 1, 128, 384>}]} {
    %c0 = arith.constant 0 : index
    %c0_0 = arith.constant 0 : index
    %c0_1 = arith.constant 0 : index
    %0 = vector.load %arg2[%c0, %c0_0, %c0_1] : memref<1x128x128xf32, #tpu.memory_space<vmem>>, vector<1x128x128xf32>
    %1 = vector.shape_cast %0 : vector<1x128x128xf32> to vector<128x128xf32>
    %c0_2 = arith.constant 0 : index
    %c0_3 = arith.constant 0 : index
    %2 = vector.load %arg3[%c0_2, %c0_3] : memref<1x128xf32, #tpu.memory_space<vmem>>, vector<1x128xf32>
    %3 = vector.shape_cast %2 : vector<1x128xf32> to vector<128xf32>
    %4 = arith.mulf %1, %1 : vector<128x128xf32>
    %cst = arith.constant dense<0.000000e+00> : vector<128xf32>
    %5 = vector.multi_reduction <add>, %4, %cst [1] : vector<128x128xf32> to vector<128xf32>
    %6 = vector.shape_cast %5 : vector<128xf32> to vector<128x1xf32>
    %cst_4 = arith.constant 1.280000e+02 : f32
    %7 = vector.broadcast %cst_4 : f32 to vector<128x1xf32>
    %8 = arith.divf %6, %7 : vector<128x1xf32>
    %cst_5 = arith.constant 9.99999974E-6 : f32
    %9 = vector.broadcast %cst_5 : f32 to vector<128x1xf32>
    %10 = arith.addf %8, %9 : vector<128x1xf32>
    %11 = math.rsqrt %10 : vector<128x1xf32>
    %12 = vector.broadcast %11 : vector<128x1xf32> to vector<128x128xf32>
    %13 = arith.mulf %1, %12 : vector<128x128xf32>
    %14 = vector.shape_cast %3 : vector<128xf32> to vector<1x128xf32>
    %15 = vector.broadcast %14 : vector<1x128xf32> to vector<128x128xf32>
    %16 = arith.mulf %15, %13 : vector<128x128xf32>
    %17 = arith.truncf %16 : vector<128x128xf32> to vector<128x128xbf16>
    %c0_6 = arith.constant 0 : index
    %c0_7 = arith.constant 0 : index
    %18 = vector.load %arg4[%c0_6, %c0_7] : memref<128x384xbf16, #tpu.memory_space<vmem>>, vector<128x384xbf16>
    %cst_8 = arith.constant dense<0.000000e+00> : vector<128x384xf32>
    %19 = tpu.matmul %17, %18, %cst_8 {dimension_numbers = #tpu.dot_dimension_numbers<[1], [0], [0], [1], [0, 0, 1, 1], [], []>} : vector<128x128xbf16>, vector<128x384xbf16>, vector<128x384xf32> -> vector<128x384xf32>
    %20 = arith.truncf %19 : vector<128x384xf32> to vector<128x384xbf16>
    %c0_9 = arith.constant 0 : index
    %c0_10 = arith.constant 0 : index
    %c0_11 = arith.constant 0 : index
    %21 = vector.load %arg5[%c0_9, %c0_10, %c0_11] : memref<1x128x384xbf16, #tpu.memory_space<vmem>>, vector<1x128x384xbf16>
    %22 = vector.shape_cast %21 : vector<1x128x384xbf16> to vector<128x384xbf16>
    %23 = vector.shape_cast %20 : vector<128x384xbf16> to vector<1x128x384xbf16>
    tpu.vector_store %arg5[%c0_9, %c0_10, %c0_11], %23 {strides = array<i32>} : memref<1x128x384xbf16, #tpu.memory_space<vmem>>, vector<1x128x384xbf16>,
    return
  }
  func.func @transform_0(%arg0: i32, %arg1: i32) -> (i32, i32, i32) {
    %c0_i32 = arith.constant 0 : i32
    %c0_i32_0 = arith.constant 0 : i32
    return %arg0, %arg1, %c0_i32 : i32, i32, i32
  }
  func.func @transform_1(%arg0: i32, %arg1: i32) -> (i32, i32) {
    %c0_i32 = arith.constant 0 : i32
    %c0_i32_0 = arith.constant 0 : i32
    %c0_i32_1 = arith.constant 0 : i32
    return %c0_i32, %c0_i32_0 : i32, i32
  }
  func.func @transform_2(%arg0: i32, %arg1: i32) -> (i32, i32) {
    %c0_i32 = arith.constant 0 : i32
    %c0_i32_0 = arith.constant 0 : i32
    %c0_i32_1 = arith.constant 0 : i32
    return %c0_i32, %c0_i32_0 : i32, i32
  }
  func.func @transform_3(%arg0: i32, %arg1: i32) -> (i32, i32, i32) {
    %c0_i32 = arith.constant 0 : i32
    %c0_i32_0 = arith.constant 0 : i32
    return %arg0, %arg1, %c0_i32 : i32, i32, i32
  }
}

module attributes {stable_mosaic.version = 11 : i64} {
  func.func @qkv_proj_kernel(%arg0: i32, %arg1: i32, %arg2: memref<1x128x128xf32, #tpu.memory_space<vmem>>, %arg3: memref<1x128xf32, #tpu.memory_space<vmem>>, %arg4: memref<128x384xbf16, #tpu.memory_space<vmem>>, %arg5: memref<1x128x384xbf16, #tpu.memory_space<vmem>>) attributes {dimension_semantics = [#tpu.dimension_semantics<parallel>, #tpu.dimension_semantics<parallel>], iteration_bounds = array<i64: 2, 2>, scalar_prefetch = 0 : i64, scratch_operands = 0 : i64, tpu.core_type = #tpu.core_type<tc>, window_params = [{transform_indices = @transform_0, window_bounds = array<i64: 1, 128, 128>}, {pipeline_mode = #tpu.pipeline_mode<synchronous>, transform_indices = @transform_1, window_bounds = array<i64: 1, 128>}, {pipeline_mode = #tpu.pipeline_mode<synchronous>, transform_indices = @transform_2, window_bounds = array<i64: 128, 384>}, {transform_indices = @transform_3, window_bounds = array<i64: 1, 128, 384>}]} {
    %c0 = arith.constant 0 : index
    %c0_0 = arith.constant 0 : index
    %c0_1 = arith.constant 0 : index
    %0 = vector.load %arg2[%c0, %c0_0, %c0_1] : memref<1x128x128xf32, #tpu.memory_space<vmem>>, vector<1x128x128xf32>
    %1 = vector.shape_cast %0 : vector<1x128x128xf32> to vector<128x128xf32>
    %c0_2 = arith.constant 0 : index
    %c0_3 = arith.constant 0 : index
    %2 = vector.load %arg3[%c0_2, %c0_3] : memref<1x128xf32, #tpu.memory_space<vmem>>, vector<1x128xf32>
    %3 = vector.shape_cast %2 : vector<1x128xf32> to vector<128xf32>
    %4 = arith.mulf %1, %1 : vector<128x128xf32>
    %cst = arith.constant dense<0.000000e+00> : vector<128xf32>
    %5 = vector.multi_reduction <add>, %4, %cst [1] : vector<128x128xf32> to vector<128xf32>
    %6 = vector.shape_cast %5 : vector<128xf32> to vector<128x1xf32>
    %cst_4 = arith.constant 1.280000e+02 : f32
    %7 = vector.broadcast %cst_4 : f32 to vector<128x1xf32>
    %8 = arith.divf %6, %7 : vector<128x1xf32>
    %cst_5 = arith.constant 9.99999974E-6 : f32
    %9 = vector.broadcast %cst_5 : f32 to vector<128x1xf32>
    %10 = arith.addf %8, %9 : vector<128x1xf32>
    %11 = math.rsqrt %10 : vector<128x1xf32>
    %12 = vector.broadcast %11 : vector<128x1xf32> to vector<128x128xf32>
    %13 = arith.mulf %1, %12 : vector<128x128xf32>
    %14 = vector.shape_cast %3 : vector<128xf32> to vector<1x128xf32>
    %15 = vector.broadcast %14 : vector<1x128xf32> to vector<128x128xf32>
    %16 = arith.mulf %15, %13 : vector<128x128xf32>
    %17 = arith.truncf %16 : vector<128x128xf32> to vector<128x128xbf16>
    %c0_6 = arith.constant 0 : index
    %c0_7 = arith.constant 0 : index
    %18 = vector.load %arg4[%c0_6, %c0_7] : memref<128x384xbf16, #tpu.memory_space<vmem>>, vector<128x384xbf16>
    %cst_8 = arith.constant dense<0.000000e+00> : vector<128x384xf32>
    %19 = tpu.matmul %17, %18, %cst_8 {dimension_numbers = #tpu.dot_dimension_numbers<[1], [0], [0], [1], [0, 0, 1, 1], [], []>} : vector<128x128xbf16>, vector<128x384xbf16>, vector<128x384xf32> -> vector<128x384xf32>
    %20 = arith.truncf %19 : vector<128x384xf32> to vector<128x384xbf16>
    %c0_9 = arith.constant 0 : index
    %c0_10 = arith.constant 0 : index
    %c0_11 = arith.constant 0 : index
    %21 = vector.load %arg5[%c0_9, %c0_10, %c0_11] : memref<1x128x384xbf16, #tpu.memory_space<vmem>>, vector<1x128x384xbf16>
    %22 = vector.shape_cast %21 : vector<1x128x384xbf16> to vector<128x384xbf16>
    %23 = vector.shape_cast %20 : vector<128x384xbf16> to vector<1x128x384xbf16>
    tpu.vector_store %arg5[%c0_9, %c0_10, %c0_11], %23 {strides = array<i32>} : memref<1x128x384xbf16, #tpu.memory_space<vmem>>, vector<1x128x384xbf16>,
    return
  }
  func.func @transform_0(%arg0: i32, %arg1: i32) -> (i32, i32, i32) {
    %c0_i32 = arith.constant 0 : i32
    %c0_i32_0 = arith.constant 0 : i32
    return %arg0, %arg1, %c0_i32 : i32, i32, i32
  }
  func.func @transform_1(%arg0: i32, %arg1: i32) -> (i32, i32) {
    %c0_i32 = arith.constant 0 : i32
    %c0_i32_0 = arith.constant 0 : i32
    %c0_i32_1 = arith.constant 0 : i32
    return %c0_i32, %c0_i32_0 : i32, i32
  }
  func.func @transform_2(%arg0: i32, %arg1: i32) -> (i32, i32) {
    %c0_i32 = arith.constant 0 : i32
    %c0_i32_0 = arith.constant 0 : i32
    %c0_i32_1 = arith.constant 0 : i32
    return %c0_i32, %c0_i32_0 : i32, i32
  }
  func.func @transform_3(%arg0: i32, %arg1: i32) -> (i32, i32, i32) {
    %c0_i32 = arith.constant 0 : i32
    %c0_i32_0 = arith.constant 0 : i32
    return %arg0, %arg1, %c0_i32 : i32, i32, i32
  }
}

</mosaic_0001>

<bundles_post_ra>
// kernel: tpu_custom_call.1
= control target key start
LH: loop header
LB: loop body
LE: loop exit
PB: predicated region body
PF: predicated region fallthrough
CT: control target
= control target key end

     0   :  { %s1927_s0 = inlined_call_operand.hbm [shape: f32[2,256,128], index: 0, kind: input, shape index: {}]   ;;  %s1928_s1 = inlined_call_operand.vmem [shape: f32[1,128], index: 1, kind: input, shape index: {}]   ;;  %s1929_s2 = inlined_call_operand.hbm [shape: bf16[128,384], index: 2, kind: input, shape index: {}]   ;;  %s1930_s3 = inlined_call_operand.hbm [shape: bf16[2,256,384], index: 3, kind: output, shape index: {}]  }
   0x1   :  { %1936 = sst [smem:[#allocation15_spill]] %s1929_s2 }
   0x2   :  { %8 = vsyncpa [#allocation3], 0 }
   0x3   :  { %10 = vsyncpa [#allocation3 + $0x1], 0 }
   0x4   :  { %11 = vsyncpa [#allocation6], 0 }
   0x5   :  { %12 = vsyncpa [#allocation4], 0 }
   0x6   :  { %14 = vsyncpa [#allocation4 + $0x1], 0  ;;  %s1567_s12 = smov 0   ;;  %s1569_s13 = smov 0  }
   0x7   :  { %s1571_s14 = smov 0   ;;  %s1573_s15 = smov 0  }
   0x8   :  { %s1575_s16 = smov 0   ;;  %s1577_s17 = smov 0  }
   0x9   :  { %s1579_s18 = smov 0   ;;  %s1581_s19 = smov 0  }
   0xa LB: > { %1937 = sst [smem:[#allocation11_spill]] %s1507_s12  ;;  %s1064_s20 = sadd.s32 4294967295, %s1535_s19   ;;  %s1535_s19 = sphi %s1581_s19, %s20_s19   ;;  %s1531_s18 = sphi %s1579_s18, %s1960_s18   ;;  %s1527_s17 = sphi %s1577_s17, %s1955_s17   ;;  %s1523_s16 = sphi %s1575_s16, %s1959_s16   ;;  %s1519_s15 = sphi %s1573_s15, %s1954_s15   ;;  %s1515_s14 = sphi %s1571_s14, %s1958_s14   ;;  %s1511_s13 = sphi %s1569_s13, %s1957_s13   ;;  %s1507_s12 = sphi %s1567_s12, %s1956_s12  }
   0xb   : > { %1938 = sst [smem:[#allocation12_spill]] %s1527_s17  ;;  %s1065_s21 = sadd.s32 4294967294, %s1535_s19  }
   0xc   : > { %p54_p0 = scmp.ne.s32.totalorder %s1511_s13, %s1507_s12  ;;  %p1611_p1 = scmp.eq.s32.totalorder %s1064_s20, 0 }
   0xd   : > { %p1615_p2 = scmp.eq.s32.totalorder %s1064_s20, 3  ;;  %p128_p3 = scmp.eq.s32.totalorder %s1065_s21, 3 }
   0xe   : > { %p1621_p4 = por %p1611_p1, %p54_p0  ;;  %p1066_p5 = scmp.ge.s32.totalorder %s1535_s19, 1 }
   0xf   : > { %p1626_p6 = por %p128_p3, %p54_p0  ;;  %p135_p7 = scmp.lt.s32.totalorder %s1535_s19, 5 }
  0x10   : > { %s1941_s24 = scalar_select %p1621_p4, 1, 0 }
  0x11   : > { %s1942_s25 = scalar_select %p1626_p6, 1, 0 }
  0x12   : > { %p1631_p8 = pnand %p1066_p5, %p135_p7  ;;  %s1537_s27 = smov [#allocation5]  }
  0x13   : > { %1943 = sst [smem:[#allocation13_spill]] %s1942_s25  ;;  %s150_s28 = sshll.u32 %s1537_s27, 4  ;;  %s151_s28 = int_to_ptr.vmem [resolvable:$true] %s150_s28 }
  0x14   : > { %p1229_p9 = pneg %p1631_p8  ;;  %s1392_s29 = scalar_lea.vmem %s151_s28, 3072 }
  0x15   : > { %p1393_p12 = scmp.ne.s32.totalorder %s151_s28, %s1392_s29  ;;  %p1400_p3 = scmp.lt.s32.totalorder %s151_s28, %s151_s28 }
  0x16   : > { %p1230_p10 = pnand %p1229_p9, %p1611_p1  ;;  %p1401_p6 = scmp.lt.s32.totalorder %s1392_s29, %s1392_s29 }
  0x18   : > { %p1383_p11 = pneg %p1230_p10  ;;  %p1402_p4 = por %p1401_p6, %p1400_p3 }
  0x1a   : > { %p1395_p13 = pnand %p1393_p12, %p1383_p11 }
  0x1c   : > { %p1396_p0 = pneg %p1395_p13 }
  0x1e   : > { %p1403_p5 = pnand %p1402_p4, %p1396_p0 }
  0x20   : > { %1406 = shalt.err (!%p1403_p5)
}
  0x21   : > { %s1538_s30 = smov 192   ;;  %s1539_s4 = smov 12  }
  0x22   : > { %s1945_s2 = sld [smem:[#allocation15_spill]]  ;;  %s29_s7 = sadd.s32 1, %s1527_s17 }
  0x23   : > { %p30_p4 = scmp.ge.s32.totalorder %s29_s7, 2  ;;  %s32_s8 = sadd.s32 1, %s1531_s18 }
  0x24   : > { %s41_s9 = sadd.s32 1, %s1515_s14  ;;  %p48_p6 = scmp.ne.s32.totalorder %s1515_s14, %s1511_s13 }
  0x25   : > { %s1962_s7 = smov (%p30_p4, %s29_s7), 0  ;;  %s1964_s8 = smov (!%p30_p4, %s32_s8), %s1531_s18 }
  0x26   : > { %1946 = sst [smem:[#allocation14_spill]] %s1962_s7  ;;  %s37_s10 = ssub.s32 %s1527_s17, %s1962_s7 }
  0x27   : > { %p49_p7 = scmp.eq.s32.totalorder %s1535_s19, 0  ;;  %p34_p9 = scmp.ge.s32.totalorder %s1964_s8, 2 }
  0x28   : > { %1232 = dma.hbm_to_vmem [thread:$0]  (!%p1230_p10), %s1945_s2, 3072, %s151_s28, [#allocation6], %s1538_s30, %s1538_s30, %s1539_s4  }
  0x29   : > { %p1655_p11 = por %p1615_p2, %p48_p6  ;;  %p1659_p10 = por %p49_p7, %p48_p6 }
  0x2a   : > { %p1242_p12 = scmp.lt.s32.totalorder %s1535_s19, 4  ;;  %s1966_s8 = smov (%p34_p9, %s1964_s8), 0 }
  0x2b   : > { %s164_s21 = sand.u32 1, %s1515_s14   ;;  %s1070_s27 = sshll.u32 %s1527_s17, 4 }
  0x2c   : > { %s36_s28 = ssub.s32 %s1531_s18, %s1966_s8  ;;  %s1069_s30 = sshll.u32 %s164_s21, 7 }
  0x2d   : > { %s38_s29 = sor.u32 %s37_s10, %s36_s28  ;;  %s1071_s23 = sshll.u32 %s1531_s18, 5 }
  0x2e   : > { %p39_p13 = scmp.eq.s32.totalorder %s38_s29, 0  ;;  %s168_s4 = scalar_lea.vmem [#allocation2], %s1069_s30 }
  0x2f   : > { %s177_s5 = sshll.u32 %s168_s4, 4  ;;  %s174_s2 = sadd.s32 %s1071_s23, %s1070_s27  ;;  %s178_s5 = int_to_ptr.vmem [resolvable:$true] %s177_s5 }
  0x30   : > { %s1672_s6 = scalar_select %p39_p13, %s1515_s14, %s41_s9  }
  0x31   : > { %s1072_s7 = sshll.u32 %s174_s2, 7  ;;  %p1678_p2 = pnand %p1242_p12, %p1659_p10 }
  0x32   : > { %s176_s10 = scalar_lea.hbm %s1927_s0, %s1072_s7  ;;  %s165_s28 = scalar_lea.sflag [#allocation3], %s164_s21 }
  0x33   : > { %p1409_p0 = pneg %p1678_p2  ;;  %s1420_s29 = scalar_lea.vmem %s178_s5, 2048 }
  0x34   : > { %p1421_p3 = scmp.ne.s32.totalorder %s178_s5, %s1420_s29  ;;  %s1540_s9 = smov [#allocation2]  }
  0x35   : > { %s1425_s2 = sshll.u32 %s1540_s9, 4  ;;  %s1426_s2 = int_to_ptr.vmem [resolvable:$false] %s1425_s2 }
  0x36   : > { %p1423_p5 = pnand %p1421_p3, %p1409_p0  ;;  %s1427_s20 = scalar_lea.vmem %s1426_s2, 4096 }
  0x37   : > { %p1428_p6 = scmp.lt.s32.totalorder %s178_s5, %s1426_s2  ;;  %p1429_p7 = scmp.lt.s32.totalorder %s1427_s20, %s1420_s29 }
  0x38   : > { %p1424_p4 = pneg %p1423_p5 }
  0x39   : > { %p1430_p9 = por %p1429_p7, %p1428_p6 }
  0x3b   : > { %p1431_p10 = pnand %p1430_p9, %p1424_p4 }
  0x3d   : > { %1434 = shalt.err (!%p1431_p10)
}
  0x3e   : > { %s1541_s27 = smov 128   ;;  %s1542_s12 = smov 8  }
  0x3f   : > { %1236 = dma.hbm_to_vmem [thread:$0]  (!%p1678_p2), %s176_s10, 2048, %s178_s5, %s165_s28, %s1541_s27, %s1541_s27, %s1542_s12  }
  0x40   : > { %189 = sbr.rel (%p1631_p8) target bundleno = 512 (0x200), region = 32  ;;  %s1692_s17 = sand.u32 (!%p1631_p8), 1, %s1511_s13  }
  0x41   : > { %s1074_s7 = sshll.u32 (!%p1631_p8), %s1692_s17, 7  ;;  %s192_s21 = scalar_lea.sflag (!%p1631_p8), [#allocation3], %s1692_s17 }
  0x42   : > { %s1696_s30 = scalar_lea.vmem (!%p1631_p8), [#allocation2], %s1074_s7  ;;  %p1950_p12 = scmp.ne.s32.totalorder (!%p1631_p8), %s1941_s24, 0 }
  0x45   : > { %1494 = dma.done.wait (%p1950_p12), %s192_s21, 2048  }
  0x46   : > { %1496 = vsyncadd (%p1950_p12), %s192_s21, 4294965248 }
  0x47   : > { %1498 = dma.done.wait (%p1611_p1), [#allocation6], 3072  }
  0x48   : > { %1500 = vsyncadd (%p1611_p1), [#allocation6], 4294964224  ;;  %v1707_v0 = vld [vmem:[%s1696_s30] sm:$0xff]  ;;  %v1710_v1 = vld [vmem:[%s1696_s30 + $0x10] sm:$0xff]  ;;  %v1543_v55 = vmov 0   ;;  %s1218_s25 = smul.u32 192, %s1692_s17 }
  0x49   : > { %v1713_v2 = vld [vmem:[%s1696_s30 + $0x8] sm:$0xff]  ;;  %v242_v3 = vmul.f32 %v1707_v0, %v1707_v0  ;;  %v244_v4 = vmul.f32 %v1710_v1, %v1710_v1  ;;  %v1720_v5 = vld [vmem:[%s1696_s30 + $0x18] sm:$0xff]  ;;  %v1730_v9 = vld [vmem:[%s1696_s30 + $0x20] sm:$0xff]  ;;  %577 = vmatprep.mubr.bf16.mxu0 %v1543_v55  ;;  %s1219_s23 = smul.u32 48, %s1519_s15  ;;  %s948_s9 = scalar_lea.sflag [#allocation4], %s1692_s17 }
  0x4a   : > { %v243_v6 = vmul.f32 %v1713_v2, %v1713_v2  ;;  %v245_v7 = vmul.f32 %v1720_v5, %v1720_v5  ;;  %v1727_v8 = vld [vmem:[%s1696_s30 + $0x28] sm:$0xff]  ;;  %v1733_v10 = vld [vmem:[%s1696_s30 + $0x38] sm:$0xff]  ;;  %v1736_v11 = vld [vmem:[%s1696_s30 + $0x30] sm:$0xff]  ;;  %v246_v15 = vmul.f32 %v1730_v9, %v1730_v9  ;;  %s1832_s26 = scalar_lea.vmem [#allocation7], %s1218_s25  ;;  %s1220_s4 = smul.u32 96, %s1523_s16 }
  0x4b   : > { %258 = vadd.xlane.f32.xlu0 %v242_v3  ;;  %262 = vadd.xlane.f32.xlu1 %v244_v4  ;;  %v1317_v12 = vld [vmem:[#allocation5 + $0xac] ss:$12 sps:$4 sm:$0xff]   ;;  %v1319_v13 = vld [vmem:[#allocation5 + $0xa8] ss:$12 sps:$4 sm:$0xff]   ;;  %v247_v14 = vmul.f32 %v1727_v8, %v1727_v8  ;;  %v1320_v16 = vld [vmem:[#allocation5 + $0xb0] ss:$12 sps:$4 sm:$0xff]   ;;  %v249_v19 = vmul.f32 %v1733_v10, %v1733_v10  ;;  %v248_v20 = vmul.f32 %v1736_v11, %v1736_v11 }
  0x4c   : > { %545 = vmatprep.subr.bf16.mxu0 %v1317_v12  ;;  %1186 = vmatprep.subr.bf16.mxu1 %v1320_v16  ;;  %v1743_v17 = vld [vmem:[%s1696_s30 + $0x48] sm:$0xff]  ;;  %v1746_v18 = vld [vmem:[%s1696_s30 + $0x40] sm:$0xff]  ;;  %v1323_v22 = vld [vmem:[#allocation5 + $0x90] ss:$12 sps:$4 sm:$0xff]   ;;  %s961_s5 = sadd.s32 %s1220_s4, %s1219_s23  ;;  %s964_s28 = sshll.u32 %s1832_s26, 4  ;;  %s1873_s28 = int_to_ptr.vmem [resolvable:$true] %s964_s28 }
  0x4d   : > { %546 = vmatpush1.bf16.msra.mxu0 %v1319_v13  ;;  %1187 = vmatpush3.bf16.msra.mxu1 %v1320_v16  ;;  %v1321_v21 = vld [vmem:[#allocation5 + $0x94] ss:$12 sps:$4 sm:$0xff]   ;;  %v1324_v23 = vld [vmem:[#allocation5 + $0x98] ss:$12 sps:$4 sm:$0xff]   ;;  %v251_v26 = vmul.f32 %v1743_v17, %v1743_v17  ;;  %v250_v27 = vmul.f32 %v1746_v18, %v1746_v18  ;;  %v1325_v28 = vld [vmem:[#allocation5 + $0x7c] ss:$12 sps:$4 sm:$0xff]  }
  0x4e   : > { %547 = vmatprep.subr.bf16.mxu0 %v1321_v21  ;;  %v1753_v24 = vld [vmem:[%s1696_s30 + $0x58] sm:$0xff]  ;;  %v1756_v25 = vld [vmem:[%s1696_s30 + $0x50] sm:$0xff]  ;;  %1188 = vmatprep.subr.bf16.mxu1 %v1324_v23  ;;  %v1328_v30 = vld [vmem:[#allocation5 + $0x80] ss:$12 sps:$4 sm:$0xff]   ;;  %s1135_s10 = sshll.u32 %s961_s5, 6  ;;  %s1435_s2 = scalar_lea.vmem %s1873_s28, 3072 }
  0x4f   : > { %260 = vadd.xlane.f32.xlu0 %v243_v6  ;;  %264 = vadd.xlane.f32.xlu1 %v245_v7  ;;  %v1327_v29 = vld [vmem:[#allocation5 + $0x78] ss:$12 sps:$4 sm:$0xff]   ;;  %v253_v31 = vmul.f32 %v1753_v24, %v1753_v24  ;;  %v252_v32 = vmul.f32 %v1756_v25, %v1756_v25  ;;  %v1767_v33 = vld [vmem:[%s1696_s30 + $0x68] sm:$0xff]  ;;  %v1336_v40 = vld [vmem:[#allocation5 + $0x50] ss:$12 sps:$4 sm:$0xff]   ;;  %s1871_s16 = scalar_lea.hbm %s1930_s3, %s1135_s10  ;;  %p1436_p1 = scmp.ne.s32.totalorder %s1873_s28, %s1435_s2 }
  0x50   : > { %v1329_v34 = vld [vmem:[#allocation5 + $0x64] ss:$12 sps:$4 sm:$0xff]   ;;  %v1331_v36 = vld [vmem:[#allocation5 + $0x60] ss:$12 sps:$4 sm:$0xff]   ;;  %v1332_v37 = vld [vmem:[#allocation5 + $0x68] ss:$12 sps:$4 sm:$0xff]   ;;  %v255_v41 = vmul.f32 %v1767_v33, %v1767_v33 }
  0x51   : > { %548 = vmatpush1.bf16.msra.mxu0 %v1323_v22  ;;  %1189 = vmatpush3.bf16.msra.mxu1 %v1324_v23  ;;  %v1770_v35 = vld [vmem:[%s1696_s30 + $0x60] sm:$0xff]  ;;  %v1333_v38 = vld [vmem:[#allocation5 + $0x4c] ss:$12 sps:$4 sm:$0xff]   ;;  %v1335_v39 = vld [vmem:[#allocation5 + $0x48] ss:$12 sps:$4 sm:$0xff]   ;;  %p1437_p8 = pnand %p1436_p1, %p1655_p11  ;;  %s1544_s20 = smov [#allocation7]  }
  0x52   : > { %549 = vmatprep.subr.bf16.mxu0 %v1325_v28  ;;  %1190 = vmatprep.subr.bf16.mxu1 %v1328_v30  ;;  %v254_v42 = vmul.f32 %v1770_v35, %v1770_v35  ;;  %v1777_v43 = vld [vmem:[%s1696_s30 + $0x78] sm:$0xff]  ;;  %v1780_v44 = vld [vmem:[%s1696_s30 + $0x70] sm:$0xff]  ;;  %v1344_v51 = vld [vmem:[#allocation5 + $0x20] ss:$12 sps:$4 sm:$0xff]   ;;  %s1439_s27 = sshll.u32 %s1544_s20, 4  ;;  %s1440_s27 = int_to_ptr.vmem [resolvable:$false] %s1439_s27 }
  0x53   : > { %268 = vadd.xlane.f32.xlu1 %v247_v14  ;;  %266 = vadd.xlane.f32.xlu0 %v246_v15  ;;  %v1337_v45 = vld [vmem:[#allocation5 + $0x34] ss:$12 sps:$4 sm:$0xff]   ;;  %v1340_v46 = vld [vmem:[#allocation5 + $0x38] ss:$12 sps:$4 sm:$0xff]   ;;  %v1339_v47 = vld [vmem:[#allocation5 + $0x30] ss:$12 sps:$4 sm:$0xff]   ;;  %v257_v48 = vmul.f32 %v1777_v43, %v1777_v43  ;;  %v256_v49 = vmul.f32 %v1780_v44, %v1780_v44  ;;  %p1438_p13 = pneg %p1437_p8  ;;  %p1442_p2 = scmp.lt.s32.totalorder %s1873_s28, %s1440_s27 }
  0x54   : > { %v1341_v50 = vld [vmem:[#allocation5 + $0x1c] ss:$12 sps:$4 sm:$0xff]   ;;  %v1343_v52 = vld [vmem:[#allocation5 + $0x18] ss:$12 sps:$4 sm:$0xff]   ;;  %v1347_v56 = vld [vmem:[#allocation5] ss:$12 sps:$4 sm:$0xff]  }
  0x55   : > { %550 = vmatpush1.bf16.msra.mxu0 %v1327_v29  ;;  %1191 = vmatpush3.bf16.msra.mxu1 %v1328_v30  ;;  %v1345_v53 = vld [vmem:[#allocation5 + $0x4] ss:$12 sps:$4 sm:$0xff]   ;;  %v1348_v54 = vld [vmem:[#allocation5 + $0x8] ss:$12 sps:$4 sm:$0xff]   ;;  %s1441_s12 = scalar_lea.vmem %s1440_s27, 6144 }
  0x56   : > { %551 = vmatprep.subr.bf16.mxu0 %v1329_v34  ;;  %1192 = vmatprep.subr.bf16.mxu1 %v1332_v37  ;;  %p1443_p0 = scmp.lt.s32.totalorder %s1441_s12, %s1435_s2 }
  0x57   : > { %272 = vadd.xlane.f32.xlu1 %v249_v19  ;;  %270 = vadd.xlane.f32.xlu0 %v248_v20 }
  0x58   : > { %p1444_p3 = por %p1443_p0, %p1442_p2 }
  0x59   : > { %552 = vmatpush1.bf16.msra.mxu0 %v1331_v36  ;;  %1193 = vmatpush3.bf16.msra.mxu1 %v1332_v37 }
  0x5a   : > { %553 = vmatprep.subr.bf16.mxu0 %v1333_v38  ;;  %1194 = vmatprep.subr.bf16.mxu1 %v1336_v40  ;;  %p1445_p5 = pnand %p1444_p3, %p1438_p13 }
  0x5b   : > { %276 = vadd.xlane.f32.xlu1 %v251_v26  ;;  %274 = vadd.xlane.f32.xlu0 %v250_v27 }
  0x5d   : > { %554 = vmatpush1.bf16.msra.mxu0 %v1335_v39  ;;  %1195 = vmatpush3.bf16.msra.mxu1 %v1336_v40 }
  0x5e   : > { %555 = vmatprep.subr.bf16.mxu0 %v1337_v45  ;;  %1196 = vmatprep.subr.bf16.mxu1 %v1340_v46  ;;  %v1792_v45 = vld [vmem:[%s1928_s1] ss:$0 sm:$0xff] }
  0x5f   : > { %280 = vadd.xlane.f32.xlu1 %v253_v31  ;;  %278 = vadd.xlane.f32.xlu0 %v252_v32 }
  0x61   : > { %556 = vmatpush1.bf16.msra.mxu0 %v1339_v47  ;;  %1197 = vmatpush3.bf16.msra.mxu1 %v1340_v46 }
  0x62   : > { %557 = vmatprep.subr.bf16.mxu0 %v1341_v50  ;;  %1198 = vmatprep.subr.bf16.mxu1 %v1344_v51 }
  0x63   : > { %284 = vadd.xlane.f32.xlu1 %v255_v41  ;;  %282 = vadd.xlane.f32.xlu0 %v254_v42 }
  0x65   : > { %558 = vmatpush1.bf16.msra.mxu0 %v1343_v52  ;;  %1199 = vmatpush3.bf16.msra.mxu1 %v1344_v51 }
  0x66   : > { %559 = vmatprep.subr.bf16.mxu0 %v1345_v53  ;;  %1200 = vmatprep.subr.bf16.mxu1 %v1348_v54 }
  0x67   : > { %288 = vadd.xlane.f32.xlu1 %v257_v48  ;;  %286 = vadd.xlane.f32.xlu0 %v256_v49 }
  0x69   : > { %560 = vmatpush1.bf16.msra.mxu0 %v1347_v56  ;;  %1201 = vmatpush3.bf16.msra.mxu1 %v1348_v54 }
  0xd4   : > { %v259_v57 = vpop.xlane.xlu0 %258  ;;  %v263_v58 = vpop.xlane.xlu1 %262 }
  0xd5   : > { %v291_v59 = vmul.f32 0.0078125, %v259_v57  ;;  %v293_v60 = vmul.f32 0.0078125, %v263_v58 }
  0xd7   : > { %v307_v61 = vadd.f32 1e-05, %v291_v59  ;;  %v309_v62 = vadd.f32 1e-05, %v293_v60 }
  0xd8   : > { %v261_v63 = vpop.xlane.xlu0 %260  ;;  %v265_v3 = vpop.xlane.xlu1 %264 }
  0xd9   : > { %1349 = vrsqrt.f32 %v307_v61  ;;  %v292_v4 = vmul.f32 0.0078125, %v261_v63  ;;  %v294_v6 = vmul.f32 0.0078125, %v265_v3 }
  0xda   : > { %1351 = vrsqrt.f32 %v309_v62 }
  0xdb   : > { %v308_v7 = vadd.f32 1e-05, %v292_v4  ;;  %v310_v12 = vadd.f32 1e-05, %v294_v6 }
  0xdc   : > { %v269_v13 = vpop.xlane.xlu1 %268  ;;  %v267_v14 = vpop.xlane.xlu0 %266 }
  0xdd   : > { %1353 = vrsqrt.f32 %v308_v7  ;;  %v296_v15 = vmul.f32 0.0078125, %v269_v13  ;;  %v295_v16 = vmul.f32 0.0078125, %v267_v14 }
  0xde   : > { %1355 = vrsqrt.f32 %v310_v12 }
  0xdf   : > { %v312_v19 = vadd.f32 1e-05, %v296_v15  ;;  %v311_v20 = vadd.f32 1e-05, %v295_v16 }
  0xe0   : > { %v273_v21 = vpop.xlane.xlu1 %272  ;;  %v271_v22 = vpop.xlane.xlu0 %270 }
  0xe1   : > { %1357 = vrsqrt.f32 %v312_v19  ;;  %v298_v23 = vmul.f32 0.0078125, %v273_v21  ;;  %v297_v26 = vmul.f32 0.0078125, %v271_v22 }
  0xe2   : > { %1359 = vrsqrt.f32 %v311_v20 }
  0xe3   : > { %v314_v27 = vadd.f32 1e-05, %v298_v23  ;;  %v313_v28 = vadd.f32 1e-05, %v297_v26 }
  0xe4   : > { %v277_v29 = vpop.xlane.xlu1 %276  ;;  %v275_v30 = vpop.xlane.xlu0 %274 }
  0xe5   : > { %1361 = vrsqrt.f32 %v314_v27  ;;  %v300_v31 = vmul.f32 0.0078125, %v277_v29  ;;  %v299_v32 = vmul.f32 0.0078125, %v275_v30 }
  0xe6   : > { %v1350_v34 = vpop.eup %1349  ;;  %1363 = vrsqrt.f32 %v313_v28 }
  0xe7   : > { %v1352_v36 = vpop.eup %1351  ;;  %v316_v37 = vadd.f32 1e-05, %v300_v31  ;;  %v315_v38 = vadd.f32 1e-05, %v299_v32  ;;  %v339_v39 = vmul.f32 %v1350_v34, %v1707_v0 }
  0xe8   : > { %v341_v40 = vmul.f32 %v1352_v36, %v1710_v1  ;;  %v281_v41 = vpop.xlane.xlu1 %280  ;;  %v279_v42 = vpop.xlane.xlu0 %278 }
  0xe9   : > { %1365 = vrsqrt.f32 %v316_v37  ;;  %v302_v46 = vmul.f32 0.0078125, %v281_v41  ;;  %v301_v47 = vmul.f32 0.0078125, %v279_v42  ;;  %v361_v0 = vmul.f32 %v1792_v45, %v339_v39 }
  0xea   : > { %v1354_v48 = vpop.eup %1353  ;;  %1367 = vrsqrt.f32 %v315_v38  ;;  %v363_v53 = vmul.f32 %v1792_v45, %v341_v40 }
  0xeb   : > { %v1356_v49 = vpop.eup %1355  ;;  %v340_v50 = vmul.f32 %v1354_v48, %v1713_v2  ;;  %v318_v51 = vadd.f32 1e-05, %v302_v46  ;;  %v317_v52 = vadd.f32 1e-05, %v301_v47 }
  0xec   : > { %v342_v1 = vmul.f32 %v1356_v49, %v1720_v5  ;;  %v285_v54 = vpop.xlane.xlu1 %284  ;;  %v283_v56 = vpop.xlane.xlu0 %282 }
  0xed   : > { %v362_v57 = vmul.f32 %v1792_v45, %v340_v50  ;;  %1369 = vrsqrt.f32 %v318_v51  ;;  %v304_v58 = vmul.f32 0.0078125, %v285_v54  ;;  %v303_v59 = vmul.f32 0.0078125, %v283_v56 }
  0xee   : > { %v1358_v60 = vpop.eup %1357  ;;  %v364_v61 = vmul.f32 %v1792_v45, %v342_v1  ;;  %1371 = vrsqrt.f32 %v317_v52 }
  0xef   : > { %v1360_v2 = vpop.eup %1359  ;;  %v377_v62 = vpack.c.bf16 %v362_v57, %v361_v0  ;;  %v344_v63 = vmul.f32 %v1358_v60, %v1727_v8  ;;  %v320_v3 = vadd.f32 1e-05, %v304_v58  ;;  %v319_v4 = vadd.f32 1e-05, %v303_v59 }
  0xf0   : > { %v378_v5 = vpack.c.bf16 %v364_v61, %v363_v53  ;;  %v343_v6 = vmul.f32 %v1360_v2, %v1730_v9  ;;  %v289_v7 = vpop.xlane.xlu1 %288  ;;  %v287_v12 = vpop.xlane.xlu0 %286 }
  0xf1   : > { %578 = vmatmul.mubr.bf16.vlgmr.msra.gmra.mxu0 %v377_v62  ;;  %1202 = vmatprep.mubr.bf16.mxu1 %v377_v62  ;;  %v366_v13 = vmul.f32 %v1792_v45, %v344_v63  ;;  %1373 = vrsqrt.f32 %v320_v3  ;;  %v306_v14 = vmul.f32 0.0078125, %v289_v7  ;;  %v305_v15 = vmul.f32 0.0078125, %v287_v12 }
  0xf2   : > { %v1362_v16 = vpop.eup %1361  ;;  %1203 = vmatmul.mubr.bf16.vlgmr.msra.gmra.mxu1 %v378_v5  ;;  %587 = vmatprep.mubr.bf16.mxu0 %v1543_v55  ;;  %v365_v8 = vmul.f32 %v1792_v45, %v343_v6  ;;  %1375 = vrsqrt.f32 %v319_v4 }
  0xf3   : > { %v1364_v19 = vpop.eup %1363  ;;  %v346_v20 = vmul.f32 %v1362_v16, %v1733_v10  ;;  %v322_v9 = vadd.f32 1e-05, %v306_v14  ;;  %v321_v21 = vadd.f32 1e-05, %v305_v15 }
  0xf4   : > { %v379_v22 = vpack.c.bf16 %v366_v13, %v365_v8  ;;  %v345_v23 = vmul.f32 %v1364_v19, %v1736_v11 }
  0xf5   : > { %v368_v26 = vmul.f32 %v1792_v45, %v346_v20  ;;  %1377 = vrsqrt.f32 %v322_v9 }
  0xf6   : > { %v1366_v27 = vpop.eup %1365  ;;  %1206 = vmatprep.mubr.bf16.mxu1 %v379_v22  ;;  %v367_v28 = vmul.f32 %v1792_v45, %v345_v23  ;;  %1379 = vrsqrt.f32 %v321_v21 }
  0xf7   : > { %v1368_v29 = vpop.eup %1367  ;;  %v348_v30 = vmul.f32 %v1366_v27, %v1743_v17 }
  0xf8   : > { %v380_v31 = vpack.c.bf16 %v368_v26, %v367_v28  ;;  %v347_v32 = vmul.f32 %v1368_v29, %v1746_v18 }
  0xf9   : > { %588 = vmatmul.mubr.bf16.gmra.mxu0 %v378_v5  ;;  %v370_v10 = vmul.f32 %v1792_v45, %v348_v30 }
  0xfa   : > { %v1370_v34 = vpop.eup %1369  ;;  %597 = vmatprep.mubr.bf16.mxu0 %v1543_v55  ;;  %1207 = vmatmul.mubr.bf16.gmra.mxu1 %v380_v31  ;;  %v369_v11 = vmul.f32 %v1792_v45, %v347_v32 }
  0xfb   : > { %v1372_v36 = vpop.eup %1371  ;;  %v350_v37 = vmul.f32 %v1370_v34, %v1753_v24 }
  0xfc   : > { %v381_v38 = vpack.c.bf16 %v370_v10, %v369_v11  ;;  %v349_v39 = vmul.f32 %v1372_v36, %v1756_v25 }
  0xfd   : > { %v372_v17 = vmul.f32 %v1792_v45, %v350_v37 }
  0xfe   : > { %v1374_v40 = vpop.eup %1373  ;;  %1210 = vmatprep.mubr.bf16.mxu1 %v381_v38  ;;  %v371_v18 = vmul.f32 %v1792_v45, %v349_v39 }
  0xff   : > { %v1376_v41 = vpop.eup %1375  ;;  %v352_v42 = vmul.f32 %v1374_v40, %v1767_v33 }
 0x100   : > { %v382_v46 = vpack.c.bf16 %v372_v17, %v371_v18  ;;  %v351_v47 = vmul.f32 %v1376_v41, %v1770_v35 }
 0x101   : > { %598 = vmatmul.mubr.bf16.gmra.mxu0 %v379_v22  ;;  %v374_v48 = vmul.f32 %v1792_v45, %v352_v42 }
 0x102   : > { %v1378_v49 = vpop.eup %1377  ;;  %607 = vmatprep.mubr.bf16.mxu0 %v1543_v55  ;;  %1211 = vmatmul.mubr.bf16.gmra.mxu1 %v382_v46  ;;  %v373_v24 = vmul.f32 %v1792_v45, %v351_v47 }
 0x103   : > { %v1380_v25 = vpop.eup %1379  ;;  %v354_v50 = vmul.f32 %v1378_v49, %v1777_v43 }
 0x104   : > { %v383_v51 = vpack.c.bf16 %v374_v48, %v373_v24  ;;  %v353_v52 = vmul.f32 %v1380_v25, %v1780_v44 }
 0x105   : > { %v376_v33 = vmul.f32 %v1792_v45, %v354_v50 }
 0x106   : > { %1214 = vmatprep.mubr.bf16.mxu1 %v383_v51  ;;  %v375_v35 = vmul.f32 %v1792_v45, %v353_v52 }
 0x108   : > { %v384_v0 = vpack.c.bf16 %v376_v33, %v375_v35 }
 0x109   : > { %608 = vmatmul.mubr.bf16.gmra.mxu0 %v380_v31 }
 0x10a   : > { %617 = vmatprep.mubr.bf16.mxu0 %v1543_v55  ;;  %1215 = vmatmul.mubr.bf16.gmra.mxu1 %v384_v0 }
 0x111   : > { %618 = vmatmul.mubr.bf16.gmra.mxu0 %v381_v38 }
 0x112   : > { %627 = vmatprep.mubr.bf16.mxu0 %v1543_v55 }
 0x119   : > { %628 = vmatmul.mubr.bf16.gmra.mxu0 %v382_v46 }
 0x11a   : > { %637 = vmatprep.mubr.bf16.mxu0 %v1543_v55 }
 0x121   : > { %638 = vmatmul.mubr.bf16.gmra.mxu0 %v383_v51 }
 0x122   : > { %647 = vmatprep.mubr.bf16.mxu0 %v1543_v55 }
 0x129   : > { %648 = vmatmul.mubr.bf16.gmra.mxu0 %v384_v0 }
 0x1b1   : > { %v579_v43 = vpop.f32.mrf.mxu0 }
 0x1b2   : > { %v1204_v44 = vpop.f32.mrf.mxu1 }
 0x1b3   : > { %v1143_v1 = vpack.c.bf16 %v1204_v44, %v1204_v44  ;;  %v581_v45 = vpop.f32.mrf.mxu0 }
 0x1b4   : > { %v1138_v53 = vpack.c.bf16 %v581_v45, %v579_v43  ;;  %v692_v54 = vpop.f32.mrf.mxu1 }
 0x1b5   : > { %920 = vst [vmem:[%s1832_s26 + $0x20] sm:$0xf] %v1143_v1  ;;  %v1139_v56 = vpack.c.bf16 %v692_v54, %v692_v54  ;;  %v583_v57 = vpop.f32.mrf.mxu0 }
 0x1b6   : > { %915 = vst [vmem:[%s1832_s26] sm:$0xff] %v1138_v53  ;;  %v1205_v55 = vpop.f32.mrf.mxu1 }
 0x1b7   : > { %916 = vst [vmem:[%s1832_s26 + $0x8] sm:$0xf] %v1139_v56  ;;  %v1145_v58 = vpack.c.bf16 %v1205_v55, %v1205_v55  ;;  %v585_v59 = vpop.f32.mrf.mxu0 }
 0x1b8   : > { %v1140_v60 = vpack.c.bf16 %v585_v59, %v583_v57  ;;  %v695_v61 = vpop.f32.mrf.mxu1 }
 0x1b9   : > { %922 = vst [vmem:[%s1832_s26 + $0x2c] sm:$0xf] %v1145_v58  ;;  %v1141_v2 = vpack.c.bf16 %v695_v61, %v695_v61  ;;  %v589_v62 = vpop.f32.mrf.mxu0 }
 0x1ba   : > { %917 = vst [vmem:[%s1832_s26 + $0xc] sm:$0xff] %v1140_v60  ;;  %v1208_v63 = vpop.f32.mrf.mxu1 }
 0x1bb   : > { %918 = vst [vmem:[%s1832_s26 + $0x14] sm:$0xf] %v1141_v2  ;;  %v591_v3 = vpop.f32.mrf.mxu0  ;;  %v1151_v4 = vpack.c.bf16 %v1208_v63, %v1208_v63 }
 0x1bc   : > { %v1142_v5 = vpack.c.bf16 %v591_v3, %v589_v62  ;;  %v708_v6 = vpop.f32.mrf.mxu1 }
 0x1bd   : > { %v593_v7 = vpop.f32.mrf.mxu0  ;;  %928 = vst [vmem:[%s1832_s26 + $0x50] sm:$0xf] %v1151_v4  ;;  %v1147_v12 = vpack.c.bf16 %v708_v6, %v708_v6 }
 0x1be   : > { %919 = vst [vmem:[%s1832_s26 + $0x18] sm:$0xff] %v1142_v5  ;;  %v1209_v13 = vpop.f32.mrf.mxu1 }
 0x1bf   : > { %v595_v14 = vpop.f32.mrf.mxu0  ;;  %924 = vst [vmem:[%s1832_s26 + $0x38] sm:$0xf] %v1147_v12  ;;  %v1153_v15 = vpack.c.bf16 %v1209_v13, %v1209_v13 }
 0x1c0   : > { %v1144_v16 = vpack.c.bf16 %v595_v14, %v593_v7  ;;  %v711_v8 = vpop.f32.mrf.mxu1 }
 0x1c1   : > { %v599_v19 = vpop.f32.mrf.mxu0  ;;  %930 = vst [vmem:[%s1832_s26 + $0x5c] sm:$0xf] %v1153_v15  ;;  %v1149_v20 = vpack.c.bf16 %v711_v8, %v711_v8 }
 0x1c2   : > { %921 = vst [vmem:[%s1832_s26 + $0x24] sm:$0xff] %v1144_v16  ;;  %v1212_v9 = vpop.f32.mrf.mxu1 }
 0x1c3   : > { %v601_v21 = vpop.f32.mrf.mxu0  ;;  %926 = vst [vmem:[%s1832_s26 + $0x44] sm:$0xf] %v1149_v20  ;;  %v1159_v22 = vpack.c.bf16 %v1212_v9, %v1212_v9 }
 0x1c4   : > { %v1146_v23 = vpack.c.bf16 %v601_v21, %v599_v19  ;;  %v724_v26 = vpop.f32.mrf.mxu1 }
 0x1c5   : > { %v603_v27 = vpop.f32.mrf.mxu0  ;;  %936 = vst [vmem:[%s1832_s26 + $0x80] sm:$0xf] %v1159_v22  ;;  %v1155_v28 = vpack.c.bf16 %v724_v26, %v724_v26 }
 0x1c6   : > { %923 = vst [vmem:[%s1832_s26 + $0x30] sm:$0xff] %v1146_v23  ;;  %v1213_v29 = vpop.f32.mrf.mxu1 }
 0x1c7   : > { %v605_v30 = vpop.f32.mrf.mxu0  ;;  %932 = vst [vmem:[%s1832_s26 + $0x68] sm:$0xf] %v1155_v28  ;;  %v1161_v31 = vpack.c.bf16 %v1213_v29, %v1213_v29 }
 0x1c8   : > { %v1148_v32 = vpack.c.bf16 %v605_v30, %v603_v27  ;;  %v727_v10 = vpop.f32.mrf.mxu1 }
 0x1c9   : > { %v609_v34 = vpop.f32.mrf.mxu0  ;;  %938 = vst [vmem:[%s1832_s26 + $0x8c] sm:$0xf] %v1161_v31  ;;  %v1157_v11 = vpack.c.bf16 %v727_v10, %v727_v10 }
 0x1ca   : > { %925 = vst [vmem:[%s1832_s26 + $0x3c] sm:$0xff] %v1148_v32  ;;  %v1216_v36 = vpop.f32.mrf.mxu1 }
 0x1cb   : > { %v611_v37 = vpop.f32.mrf.mxu0  ;;  %934 = vst [vmem:[%s1832_s26 + $0x74] sm:$0xf] %v1157_v11  ;;  %v1167_v38 = vpack.c.bf16 %v1216_v36, %v1216_v36 }
 0x1cc   : > { %v1150_v39 = vpack.c.bf16 %v611_v37, %v609_v34  ;;  %v740_v17 = vpop.f32.mrf.mxu1 }
 0x1cd   : > { %v613_v40 = vpop.f32.mrf.mxu0  ;;  %944 = vst [vmem:[%s1832_s26 + $0xb0] sm:$0xf] %v1167_v38  ;;  %v1163_v18 = vpack.c.bf16 %v740_v17, %v740_v17 }
 0x1ce   : > { %927 = vst [vmem:[%s1832_s26 + $0x48] sm:$0xff] %v1150_v39  ;;  %v1217_v41 = vpop.f32.mrf.mxu1 }
 0x1cf   : > { %v615_v42 = vpop.f32.mrf.mxu0  ;;  %940 = vst [vmem:[%s1832_s26 + $0x98] sm:$0xf] %v1163_v18  ;;  %v1169_v46 = vpack.c.bf16 %v1217_v41, %v1217_v41 }
 0x1d0   : > { %v1152_v47 = vpack.c.bf16 %v615_v42, %v613_v40  ;;  %v743_v48 = vpop.f32.mrf.mxu1 }
 0x1d1   : > { %v619_v49 = vpop.f32.mrf.mxu0  ;;  %946 = vst [vmem:[%s1832_s26 + $0xbc] sm:$0xf] %v1169_v46  ;;  %v1165_v24 = vpack.c.bf16 %v743_v48, %v743_v48 }
 0x1d2   : > { %929 = vst [vmem:[%s1832_s26 + $0x54] sm:$0xff] %v1152_v47 }
 0x1d3   : > { %v621_v25 = vpop.f32.mrf.mxu0  ;;  %942 = vst [vmem:[%s1832_s26 + $0xa4] sm:$0xf] %v1165_v24 }
 0x1d4   : > { %v1154_v50 = vpack.c.bf16 %v621_v25, %v619_v49 }
 0x1d5   : > { %v623_v51 = vpop.f32.mrf.mxu0 }
 0x1d6   : > { %931 = vst [vmem:[%s1832_s26 + $0x60] sm:$0xff] %v1154_v50 }
 0x1d7   : > { %v625_v52 = vpop.f32.mrf.mxu0 }
 0x1d8   : > { %v1156_v33 = vpack.c.bf16 %v625_v52, %v623_v51 }
 0x1d9   : > { %v629_v35 = vpop.f32.mrf.mxu0 }
 0x1da   : > { %933 = vst [vmem:[%s1832_s26 + $0x6c] sm:$0xff] %v1156_v33 }
 0x1db   : > { %v631_v0 = vpop.f32.mrf.mxu0 }
 0x1dc   : > { %v1158_v43 = vpack.c.bf16 %v631_v0, %v629_v35 }
 0x1dd   : > { %v633_v44 = vpop.f32.mrf.mxu0 }
 0x1de   : > { %935 = vst [vmem:[%s1832_s26 + $0x78] sm:$0xff] %v1158_v43 }
 0x1df   : > { %v635_v1 = vpop.f32.mrf.mxu0 }
 0x1e0   : > { %v1160_v45 = vpack.c.bf16 %v635_v1, %v633_v44 }
 0x1e1   : > { %v639_v53 = vpop.f32.mrf.mxu0 }
 0x1e2   : > { %937 = vst [vmem:[%s1832_s26 + $0x84] sm:$0xff] %v1160_v45 }
 0x1e3   : > { %v641_v54 = vpop.f32.mrf.mxu0 }
 0x1e4   : > { %v1162_v56 = vpack.c.bf16 %v641_v54, %v639_v53 }
 0x1e5   : > { %v643_v57 = vpop.f32.mrf.mxu0 }
 0x1e6   : > { %939 = vst [vmem:[%s1832_s26 + $0x90] sm:$0xff] %v1162_v56 }
 0x1e7   : > { %v645_v55 = vpop.f32.mrf.mxu0 }
 0x1e8   : > { %v1164_v58 = vpack.c.bf16 %v645_v55, %v643_v57 }
 0x1e9   : > { %v649_v59 = vpop.f32.mrf.mxu0 }
 0x1ea   : > { %941 = vst [vmem:[%s1832_s26 + $0x9c] sm:$0xff] %v1164_v58 }
 0x1eb   : > { %v651_v60 = vpop.f32.mrf.mxu0 }
 0x1ec   : > { %v1166_v61 = vpack.c.bf16 %v651_v60, %v649_v59 }
 0x1ed   : > { %v653_v2 = vpop.f32.mrf.mxu0 }
 0x1ee   : > { %943 = vst [vmem:[%s1832_s26 + $0xa8] sm:$0xff] %v1166_v61 }
 0x1ef   : > { %v655_v62 = vpop.f32.mrf.mxu0 }
 0x1f0   : > { %v1168_v63 = vpack.c.bf16 %v655_v62, %v653_v2 }
 0x1f2   : > { %945 = vst [vmem:[%s1832_s26 + $0xb4] sm:$0xff] %v1168_v63 }
 0x1f3   : > { %1448 = shalt.err (!%p1445_p5)
}
 0x1f4   : > { %s1449_s7 = scalar_lea.hbm %s1871_s16, 3072  ;;  %s1453_s22 = scalar_lea.hbm %s1930_s3, 12288 }
 0x1f5   : > { %p1450_p4 = scmp.ne.s32.totalorder %s1871_s16, %s1449_s7  ;;  %p1454_p9 = scmp.lt.s32.totalorder %s1871_s16, %s1930_s3 }
 0x1f6   : > { %p1455_p10 = scmp.lt.s32.totalorder %s1453_s22, %s1449_s7 }
 0x1f7   : > { %p1451_p6 = pnand %p1450_p4, %p1655_p11 }
 0x1f8   : > { %p1456_p12 = por %p1455_p10, %p1454_p9 }
 0x1f9   : > { %p1452_p7 = pneg %p1451_p6 }
 0x1fb   : > { %p1457_p1 = pnand %p1456_p12, %p1452_p7 }
 0x1fd   : > { %1460 = shalt.err (!%p1457_p1)
}
 0x1fe   : > { %s1545_s26 = smov 192   ;;  %s1546_s23 = smov 12  }
 0x1ff   : > { %1227 = dma.vmem_to_hbm [thread:$0]  (%p1655_p11), %s1873_s28, 3072, %s1871_s16, %s948_s9, %s1545_s26, %s1545_s26, %s1546_s23  }
 0x200 PF: > { %s1951_s4 = sld [smem:[#allocation11_spill]]  ;;  %p1244_p8 = scmp.ge.s32.totalorder %s1535_s19, 2 }
 0x201   : > { %s1952_s5 = sld [smem:[#allocation13_spill]] }
 0x206   : > { %s979_s10 = sand.u32 1, %s1951_s4  }
 0x207   : > { %p1953_p13 = scmp.ne.s32.totalorder %s1952_s5, 0  ;;  %s980_s29 = scalar_lea.sflag [#allocation4], %s979_s10 }
 0x209   : > { %p1238_p2 = pnand %p1244_p8, %p1953_p13 }
 0x20b   : > { %p1239_p0 = pneg %p1238_p2 }
 0x20d   : > { %1502 = dma.done.wait (%p1239_p0), %s980_s29, 3072  }
 0x20e   : > { %1504 = vsyncadd (%p1239_p0), %s980_s29, 4294964224  ;;  %s20_s19 = sadd.s32 1, %s1535_s19   ;;  %s1954_s15 = sld [smem:[#allocation12_spill]] }
 0x20f   : > { %p17_p3 = scmp.ge.s32.totalorder %s20_s19, 6   ;;  %s1955_s17 = sld [smem:[#allocation14_spill]] }
 0x210   : > { %s1956_s12 = smov %s1511_s13  ;;  %s1957_s13 = smov %s1515_s14 }
 0x211   : > { %s1958_s14 = smov %s1672_s6  ;;  %s1959_s16 = smov %s1531_s18 }
 0x212   : > { %s1960_s18 = smov %s1966_s8  ;;  %19 = sbr.rel (!%p17_p3) target bundleno = 10 (0xa), region = 81 }
 0x217   :  { %985 = vsyncpa [#allocation3], 1 }
 0x218   :  { %987 = vsyncpa [#allocation3 + $0x1], 1 }
 0x219   :  { %988 = vsyncpa [#allocation6], 1 }
 0x21a   :  { %989 = vsyncpa [#allocation4], 1 }
 0x21b   :  { %991 = vsyncpa [#allocation4 + $0x1], 1 }

// kernel: tpu_custom_call.1
= control target key start
LH: loop header
LB: loop body
LE: loop exit
PB: predicated region body
PF: predicated region fallthrough
CT: control target
= control target key end

     0   :  { %s1927_s0 = inlined_call_operand.hbm [shape: f32[2,256,128], index: 0, kind: input, shape index: {}]   ;;  %s1928_s1 = inlined_call_operand.vmem [shape: f32[1,128], index: 1, kind: input, shape index: {}]   ;;  %s1929_s2 = inlined_call_operand.hbm [shape: bf16[128,384], index: 2, kind: input, shape index: {}]   ;;  %s1930_s3 = inlined_call_operand.hbm [shape: bf16[2,256,384], index: 3, kind: output, shape index: {}]  }
   0x1   :  { %1936 = sst [smem:[#allocation15_spill]] %s1929_s2 }
   0x2   :  { %8 = vsyncpa [#allocation3], 0 }
   0x3   :  { %10 = vsyncpa [#allocation3 + $0x1], 0 }
   0x4   :  { %11 = vsyncpa [#allocation6], 0 }
   0x5   :  { %12 = vsyncpa [#allocation4], 0 }
   0x6   :  { %14 = vsyncpa [#allocation4 + $0x1], 0  ;;  %s1567_s12 = smov 0   ;;  %s1569_s13 = smov 0  }
   0x7   :  { %s1571_s14 = smov 0   ;;  %s1573_s15 = smov 0  }
   0x8   :  { %s1575_s16 = smov 0   ;;  %s1577_s17 = smov 0  }
   0x9   :  { %s1579_s18 = smov 0   ;;  %s1581_s19 = smov 0  }
   0xa LB: > { %1937 = sst [smem:[#allocation11_spill]] %s1507_s12  ;;  %s1064_s20 = sadd.s32 4294967295, %s1535_s19   ;;  %s1535_s19 = sphi %s1581_s19, %s20_s19   ;;  %s1531_s18 = sphi %s1579_s18, %s1960_s18   ;;  %s1527_s17 = sphi %s1577_s17, %s1955_s17   ;;  %s1523_s16 = sphi %s1575_s16, %s1959_s16   ;;  %s1519_s15 = sphi %s1573_s15, %s1954_s15   ;;  %s1515_s14 = sphi %s1571_s14, %s1958_s14   ;;  %s1511_s13 = sphi %s1569_s13, %s1957_s13   ;;  %s1507_s12 = sphi %s1567_s12, %s1956_s12  }
   0xb   : > { %1938 = sst [smem:[#allocation12_spill]] %s1527_s17  ;;  %s1065_s21 = sadd.s32 4294967294, %s1535_s19  }
   0xc   : > { %p54_p0 = scmp.ne.s32.totalorder %s1511_s13, %s1507_s12  ;;  %p1611_p1 = scmp.eq.s32.totalorder %s1064_s20, 0 }
   0xd   : > { %p1615_p2 = scmp.eq.s32.totalorder %s1064_s20, 3  ;;  %p128_p3 = scmp.eq.s32.totalorder %s1065_s21, 3 }
   0xe   : > { %p1621_p4 = por %p1611_p1, %p54_p0  ;;  %p1066_p5 = scmp.ge.s32.totalorder %s1535_s19, 1 }
   0xf   : > { %p1626_p6 = por %p128_p3, %p54_p0  ;;  %p135_p7 = scmp.lt.s32.totalorder %s1535_s19, 5 }
  0x10   : > { %s1941_s24 = scalar_select %p1621_p4, 1, 0 }
  0x11   : > { %s1942_s25 = scalar_select %p1626_p6, 1, 0 }
  0x12   : > { %p1631_p8 = pnand %p1066_p5, %p135_p7  ;;  %s1537_s27 = smov [#allocation5]  }
  0x13   : > { %1943 = sst [smem:[#allocation13_spill]] %s1942_s25  ;;  %s150_s28 = sshll.u32 %s1537_s27, 4  ;;  %s151_s28 = int_to_ptr.vmem [resolvable:$true] %s150_s28 }
  0x14   : > { %p1229_p9 = pneg %p1631_p8  ;;  %s1392_s29 = scalar_lea.vmem %s151_s28, 3072 }
  0x15   : > { %p1393_p12 = scmp.ne.s32.totalorder %s151_s28, %s1392_s29  ;;  %p1400_p3 = scmp.lt.s32.totalorder %s151_s28, %s151_s28 }
  0x16   : > { %p1230_p10 = pnand %p1229_p9, %p1611_p1  ;;  %p1401_p6 = scmp.lt.s32.totalorder %s1392_s29, %s1392_s29 }
  0x18   : > { %p1383_p11 = pneg %p1230_p10  ;;  %p1402_p4 = por %p1401_p6, %p1400_p3 }
  0x1a   : > { %p1395_p13 = pnand %p1393_p12, %p1383_p11 }
  0x1c   : > { %p1396_p0 = pneg %p1395_p13 }
  0x1e   : > { %p1403_p5 = pnand %p1402_p4, %p1396_p0 }
  0x20   : > { %1406 = shalt.err (!%p1403_p5)
}
  0x21   : > { %s1538_s30 = smov 192   ;;  %s1539_s4 = smov 12  }
  0x22   : > { %s1945_s2 = sld [smem:[#allocation15_spill]]  ;;  %s29_s7 = sadd.s32 1, %s1527_s17 }
  0x23   : > { %p30_p4 = scmp.ge.s32.totalorder %s29_s7, 2  ;;  %s32_s8 = sadd.s32 1, %s1531_s18 }
  0x24   : > { %s41_s9 = sadd.s32 1, %s1515_s14  ;;  %p48_p6 = scmp.ne.s32.totalorder %s1515_s14, %s1511_s13 }
  0x25   : > { %s1962_s7 = smov (%p30_p4, %s29_s7), 0  ;;  %s1964_s8 = smov (!%p30_p4, %s32_s8), %s1531_s18 }
  0x26   : > { %1946 = sst [smem:[#allocation14_spill]] %s1962_s7  ;;  %s37_s10 = ssub.s32 %s1527_s17, %s1962_s7 }
  0x27   : > { %p49_p7 = scmp.eq.s32.totalorder %s1535_s19, 0  ;;  %p34_p9 = scmp.ge.s32.totalorder %s1964_s8, 2 }
  0x28   : > { %1232 = dma.hbm_to_vmem [thread:$0]  (!%p1230_p10), %s1945_s2, 3072, %s151_s28, [#allocation6], %s1538_s30, %s1538_s30, %s1539_s4  }
  0x29   : > { %p1655_p11 = por %p1615_p2, %p48_p6  ;;  %p1659_p10 = por %p49_p7, %p48_p6 }
  0x2a   : > { %p1242_p12 = scmp.lt.s32.totalorder %s1535_s19, 4  ;;  %s1966_s8 = smov (%p34_p9, %s1964_s8), 0 }
  0x2b   : > { %s164_s21 = sand.u32 1, %s1515_s14   ;;  %s1070_s27 = sshll.u32 %s1527_s17, 4 }
  0x2c   : > { %s36_s28 = ssub.s32 %s1531_s18, %s1966_s8  ;;  %s1069_s30 = sshll.u32 %s164_s21, 7 }
  0x2d   : > { %s38_s29 = sor.u32 %s37_s10, %s36_s28  ;;  %s1071_s23 = sshll.u32 %s1531_s18, 5 }
  0x2e   : > { %p39_p13 = scmp.eq.s32.totalorder %s38_s29, 0  ;;  %s168_s4 = scalar_lea.vmem [#allocation2], %s1069_s30 }
  0x2f   : > { %s177_s5 = sshll.u32 %s168_s4, 4  ;;  %s174_s2 = sadd.s32 %s1071_s23, %s1070_s27  ;;  %s178_s5 = int_to_ptr.vmem [resolvable:$true] %s177_s5 }
  0x30   : > { %s1672_s6 = scalar_select %p39_p13, %s1515_s14, %s41_s9  }
  0x31   : > { %s1072_s7 = sshll.u32 %s174_s2, 7  ;;  %p1678_p2 = pnand %p1242_p12, %p1659_p10 }
  0x32   : > { %s176_s10 = scalar_lea.hbm %s1927_s0, %s1072_s7  ;;  %s165_s28 = scalar_lea.sflag [#allocation3], %s164_s21 }
  0x33   : > { %p1409_p0 = pneg %p1678_p2  ;;  %s1420_s29 = scalar_lea.vmem %s178_s5, 2048 }
  0x34   : > { %p1421_p3 = scmp.ne.s32.totalorder %s178_s5, %s1420_s29  ;;  %s1540_s9 = smov [#allocation2]  }
  0x35   : > { %s1425_s2 = sshll.u32 %s1540_s9, 4  ;;  %s1426_s2 = int_to_ptr.vmem [resolvable:$false] %s1425_s2 }
  0x36   : > { %p1423_p5 = pnand %p1421_p3, %p1409_p0  ;;  %s1427_s20 = scalar_lea.vmem %s1426_s2, 4096 }
  0x37   : > { %p1428_p6 = scmp.lt.s32.totalorder %s178_s5, %s1426_s2  ;;  %p1429_p7 = scmp.lt.s32.totalorder %s1427_s20, %s1420_s29 }
  0x38   : > { %p1424_p4 = pneg %p1423_p5 }
  0x39   : > { %p1430_p9 = por %p1429_p7, %p1428_p6 }
  0x3b   : > { %p1431_p10 = pnand %p1430_p9, %p1424_p4 }
  0x3d   : > { %1434 = shalt.err (!%p1431_p10)
}
  0x3e   : > { %s1541_s27 = smov 128   ;;  %s1542_s12 = smov 8  }
  0x3f   : > { %1236 = dma.hbm_to_vmem [thread:$0]  (!%p1678_p2), %s176_s10, 2048, %s178_s5, %s165_s28, %s1541_s27, %s1541_s27, %s1542_s12  }
  0x40   : > { %189 = sbr.rel (%p1631_p8) target bundleno = 512 (0x200), region = 32  ;;  %s1692_s17 = sand.u32 (!%p1631_p8), 1, %s1511_s13  }
  0x41   : > { %s1074_s7 = sshll.u32 (!%p1631_p8), %s1692_s17, 7  ;;  %s192_s21 = scalar_lea.sflag (!%p1631_p8), [#allocation3], %s1692_s17 }
  0x42   : > { %s1696_s30 = scalar_lea.vmem (!%p1631_p8), [#allocation2], %s1074_s7  ;;  %p1950_p12 = scmp.ne.s32.totalorder (!%p1631_p8), %s1941_s24, 0 }
  0x45   : > { %1494 = dma.done.wait (%p1950_p12), %s192_s21, 2048  }
  0x46   : > { %1496 = vsyncadd (%p1950_p12), %s192_s21, 4294965248 }
  0x47   : > { %1498 = dma.done.wait (%p1611_p1), [#allocation6], 3072  }
  0x48   : > { %1500 = vsyncadd (%p1611_p1), [#allocation6], 4294964224  ;;  %v1707_v0 = vld [vmem:[%s1696_s30] sm:$0xff]  ;;  %v1710_v1 = vld [vmem:[%s1696_s30 + $0x10] sm:$0xff]  ;;  %v1543_v55 = vmov 0   ;;  %s1218_s25 = smul.u32 192, %s1692_s17 }
  0x49   : > { %v1713_v2 = vld [vmem:[%s1696_s30 + $0x8] sm:$0xff]  ;;  %v242_v3 = vmul.f32 %v1707_v0, %v1707_v0  ;;  %v244_v4 = vmul.f32 %v1710_v1, %v1710_v1  ;;  %v1720_v5 = vld [vmem:[%s1696_s30 + $0x18] sm:$0xff]  ;;  %v1730_v9 = vld [vmem:[%s1696_s30 + $0x20] sm:$0xff]  ;;  %577 = vmatprep.mubr.bf16.mxu0 %v1543_v55  ;;  %s1219_s23 = smul.u32 48, %s1519_s15  ;;  %s948_s9 = scalar_lea.sflag [#allocation4], %s1692_s17 }
  0x4a   : > { %v243_v6 = vmul.f32 %v1713_v2, %v1713_v2  ;;  %v245_v7 = vmul.f32 %v1720_v5, %v1720_v5  ;;  %v1727_v8 = vld [vmem:[%s1696_s30 + $0x28] sm:$0xff]  ;;  %v1733_v10 = vld [vmem:[%s1696_s30 + $0x38] sm:$0xff]  ;;  %v1736_v11 = vld [vmem:[%s1696_s30 + $0x30] sm:$0xff]  ;;  %v246_v15 = vmul.f32 %v1730_v9, %v1730_v9  ;;  %s1832_s26 = scalar_lea.vmem [#allocation7], %s1218_s25  ;;  %s1220_s4 = smul.u32 96, %s1523_s16 }
  0x4b   : > { %258 = vadd.xlane.f32.xlu0 %v242_v3  ;;  %262 = vadd.xlane.f32.xlu1 %v244_v4  ;;  %v1317_v12 = vld [vmem:[#allocation5 + $0xac] ss:$12 sps:$4 sm:$0xff]   ;;  %v1319_v13 = vld [vmem:[#allocation5 + $0xa8] ss:$12 sps:$4 sm:$0xff]   ;;  %v247_v14 = vmul.f32 %v1727_v8, %v1727_v8  ;;  %v1320_v16 = vld [vmem:[#allocation5 + $0xb0] ss:$12 sps:$4 sm:$0xff]   ;;  %v249_v19 = vmul.f32 %v1733_v10, %v1733_v10  ;;  %v248_v20 = vmul.f32 %v1736_v11, %v1736_v11 }
  0x4c   : > { %545 = vmatprep.subr.bf16.mxu0 %v1317_v12  ;;  %1186 = vmatprep.subr.bf16.mxu1 %v1320_v16  ;;  %v1743_v17 = vld [vmem:[%s1696_s30 + $0x48] sm:$0xff]  ;;  %v1746_v18 = vld [vmem:[%s1696_s30 + $0x40] sm:$0xff]  ;;  %v1323_v22 = vld [vmem:[#allocation5 + $0x90] ss:$12 sps:$4 sm:$0xff]   ;;  %s961_s5 = sadd.s32 %s1220_s4, %s1219_s23  ;;  %s964_s28 = sshll.u32 %s1832_s26, 4  ;;  %s1873_s28 = int_to_ptr.vmem [resolvable:$true] %s964_s28 }
  0x4d   : > { %546 = vmatpush1.bf16.msra.mxu0 %v1319_v13  ;;  %1187 = vmatpush3.bf16.msra.mxu1 %v1320_v16  ;;  %v1321_v21 = vld [vmem:[#allocation5 + $0x94] ss:$12 sps:$4 sm:$0xff]   ;;  %v1324_v23 = vld [vmem:[#allocation5 + $0x98] ss:$12 sps:$4 sm:$0xff]   ;;  %v251_v26 = vmul.f32 %v1743_v17, %v1743_v17  ;;  %v250_v27 = vmul.f32 %v1746_v18, %v1746_v18  ;;  %v1325_v28 = vld [vmem:[#allocation5 + $0x7c] ss:$12 sps:$4 sm:$0xff]  }
  0x4e   : > { %547 = vmatprep.subr.bf16.mxu0 %v1321_v21  ;;  %v1753_v24 = vld [vmem:[%s1696_s30 + $0x58] sm:$0xff]  ;;  %v1756_v25 = vld [vmem:[%s1696_s30 + $0x50] sm:$0xff]  ;;  %1188 = vmatprep.subr.bf16.mxu1 %v1324_v23  ;;  %v1328_v30 = vld [vmem:[#allocation5 + $0x80] ss:$12 sps:$4 sm:$0xff]   ;;  %s1135_s10 = sshll.u32 %s961_s5, 6  ;;  %s1435_s2 = scalar_lea.vmem %s1873_s28, 3072 }
  0x4f   : > { %260 = vadd.xlane.f32.xlu0 %v243_v6  ;;  %264 = vadd.xlane.f32.xlu1 %v245_v7  ;;  %v1327_v29 = vld [vmem:[#allocation5 + $0x78] ss:$12 sps:$4 sm:$0xff]   ;;  %v253_v31 = vmul.f32 %v1753_v24, %v1753_v24  ;;  %v252_v32 = vmul.f32 %v1756_v25, %v1756_v25  ;;  %v1767_v33 = vld [vmem:[%s1696_s30 + $0x68] sm:$0xff]  ;;  %v1336_v40 = vld [vmem:[#allocation5 + $0x50] ss:$12 sps:$4 sm:$0xff]   ;;  %s1871_s16 = scalar_lea.hbm %s1930_s3, %s1135_s10  ;;  %p1436_p1 = scmp.ne.s32.totalorder %s1873_s28, %s1435_s2 }
  0x50   : > { %v1329_v34 = vld [vmem:[#allocation5 + $0x64] ss:$12 sps:$4 sm:$0xff]   ;;  %v1331_v36 = vld [vmem:[#allocation5 + $0x60] ss:$12 sps:$4 sm:$0xff]   ;;  %v1332_v37 = vld [vmem:[#allocation5 + $0x68] ss:$12 sps:$4 sm:$0xff]   ;;  %v255_v41 = vmul.f32 %v1767_v33, %v1767_v33 }
  0x51   : > { %548 = vmatpush1.bf16.msra.mxu0 %v1323_v22  ;;  %1189 = vmatpush3.bf16.msra.mxu1 %v1324_v23  ;;  %v1770_v35 = vld [vmem:[%s1696_s30 + $0x60] sm:$0xff]  ;;  %v1333_v38 = vld [vmem:[#allocation5 + $0x4c] ss:$12 sps:$4 sm:$0xff]   ;;  %v1335_v39 = vld [vmem:[#allocation5 + $0x48] ss:$12 sps:$4 sm:$0xff]   ;;  %p1437_p8 = pnand %p1436_p1, %p1655_p11  ;;  %s1544_s20 = smov [#allocation7]  }
  0x52   : > { %549 = vmatprep.subr.bf16.mxu0 %v1325_v28  ;;  %1190 = vmatprep.subr.bf16.mxu1 %v1328_v30  ;;  %v254_v42 = vmul.f32 %v1770_v35, %v1770_v35  ;;  %v1777_v43 = vld [vmem:[%s1696_s30 + $0x78] sm:$0xff]  ;;  %v1780_v44 = vld [vmem:[%s1696_s30 + $0x70] sm:$0xff]  ;;  %v1344_v51 = vld [vmem:[#allocation5 + $0x20] ss:$12 sps:$4 sm:$0xff]   ;;  %s1439_s27 = sshll.u32 %s1544_s20, 4  ;;  %s1440_s27 = int_to_ptr.vmem [resolvable:$false] %s1439_s27 }
  0x53   : > { %268 = vadd.xlane.f32.xlu1 %v247_v14  ;;  %266 = vadd.xlane.f32.xlu0 %v246_v15  ;;  %v1337_v45 = vld [vmem:[#allocation5 + $0x34] ss:$12 sps:$4 sm:$0xff]   ;;  %v1340_v46 = vld [vmem:[#allocation5 + $0x38] ss:$12 sps:$4 sm:$0xff]   ;;  %v1339_v47 = vld [vmem:[#allocation5 + $0x30] ss:$12 sps:$4 sm:$0xff]   ;;  %v257_v48 = vmul.f32 %v1777_v43, %v1777_v43  ;;  %v256_v49 = vmul.f32 %v1780_v44, %v1780_v44  ;;  %p1438_p13 = pneg %p1437_p8  ;;  %p1442_p2 = scmp.lt.s32.totalorder %s1873_s28, %s1440_s27 }
  0x54   : > { %v1341_v50 = vld [vmem:[#allocation5 + $0x1c] ss:$12 sps:$4 sm:$0xff]   ;;  %v1343_v52 = vld [vmem:[#allocation5 + $0x18] ss:$12 sps:$4 sm:$0xff]   ;;  %v1347_v56 = vld [vmem:[#allocation5] ss:$12 sps:$4 sm:$0xff]  }
  0x55   : > { %550 = vmatpush1.bf16.msra.mxu0 %v1327_v29  ;;  %1191 = vmatpush3.bf16.msra.mxu1 %v1328_v30  ;;  %v1345_v53 = vld [vmem:[#allocation5 + $0x4] ss:$12 sps:$4 sm:$0xff]   ;;  %v1348_v54 = vld [vmem:[#allocation5 + $0x8] ss:$12 sps:$4 sm:$0xff]   ;;  %s1441_s12 = scalar_lea.vmem %s1440_s27, 6144 }
  0x56   : > { %551 = vmatprep.subr.bf16.mxu0 %v1329_v34  ;;  %1192 = vmatprep.subr.bf16.mxu1 %v1332_v37  ;;  %p1443_p0 = scmp.lt.s32.totalorder %s1441_s12, %s1435_s2 }
  0x57   : > { %272 = vadd.xlane.f32.xlu1 %v249_v19  ;;  %270 = vadd.xlane.f32.xlu0 %v248_v20 }
  0x58   : > { %p1444_p3 = por %p1443_p0, %p1442_p2 }
  0x59   : > { %552 = vmatpush1.bf16.msra.mxu0 %v1331_v36  ;;  %1193 = vmatpush3.bf16.msra.mxu1 %v1332_v37 }
  0x5a   : > { %553 = vmatprep.subr.bf16.mxu0 %v1333_v38  ;;  %1194 = vmatprep.subr.bf16.mxu1 %v1336_v40  ;;  %p1445_p5 = pnand %p1444_p3, %p1438_p13 }
  0x5b   : > { %276 = vadd.xlane.f32.xlu1 %v251_v26  ;;  %274 = vadd.xlane.f32.xlu0 %v250_v27 }
  0x5d   : > { %554 = vmatpush1.bf16.msra.mxu0 %v1335_v39  ;;  %1195 = vmatpush3.bf16.msra.mxu1 %v1336_v40 }
  0x5e   : > { %555 = vmatprep.subr.bf16.mxu0 %v1337_v45  ;;  %1196 = vmatprep.subr.bf16.mxu1 %v1340_v46  ;;  %v1792_v45 = vld [vmem:[%s1928_s1] ss:$0 sm:$0xff] }
  0x5f   : > { %280 = vadd.xlane.f32.xlu1 %v253_v31  ;;  %278 = vadd.xlane.f32.xlu0 %v252_v32 }
  0x61   : > { %556 = vmatpush1.bf16.msra.mxu0 %v1339_v47  ;;  %1197 = vmatpush3.bf16.msra.mxu1 %v1340_v46 }
  0x62   : > { %557 = vmatprep.subr.bf16.mxu0 %v1341_v50  ;;  %1198 = vmatprep.subr.bf16.mxu1 %v1344_v51 }
  0x63   : > { %284 = vadd.xlane.f32.xlu1 %v255_v41  ;;  %282 = vadd.xlane.f32.xlu0 %v254_v42 }
  0x65   : > { %558 = vmatpush1.bf16.msra.mxu0 %v1343_v52  ;;  %1199 = vmatpush3.bf16.msra.mxu1 %v1344_v51 }
  0x66   : > { %559 = vmatprep.subr.bf16.mxu0 %v1345_v53  ;;  %1200 = vmatprep.subr.bf16.mxu1 %v1348_v54 }
  0x67   : > { %288 = vadd.xlane.f32.xlu1 %v257_v48  ;;  %286 = vadd.xlane.f32.xlu0 %v256_v49 }
  0x69   : > { %560 = vmatpush1.bf16.msra.mxu0 %v1347_v56  ;;  %1201 = vmatpush3.bf16.msra.mxu1 %v1348_v54 }
  0xd4   : > { %v259_v57 = vpop.xlane.xlu0 %258  ;;  %v263_v58 = vpop.xlane.xlu1 %262 }
  0xd5   : > { %v291_v59 = vmul.f32 0.0078125, %v259_v57  ;;  %v293_v60 = vmul.f32 0.0078125, %v263_v58 }
  0xd7   : > { %v307_v61 = vadd.f32 1e-05, %v291_v59  ;;  %v309_v62 = vadd.f32 1e-05, %v293_v60 }
  0xd8   : > { %v261_v63 = vpop.xlane.xlu0 %260  ;;  %v265_v3 = vpop.xlane.xlu1 %264 }
  0xd9   : > { %1349 = vrsqrt.f32 %v307_v61  ;;  %v292_v4 = vmul.f32 0.0078125, %v261_v63  ;;  %v294_v6 = vmul.f32 0.0078125, %v265_v3 }
  0xda   : > { %1351 = vrsqrt.f32 %v309_v62 }
  0xdb   : > { %v308_v7 = vadd.f32 1e-05, %v292_v4  ;;  %v310_v12 = vadd.f32 1e-05, %v294_v6 }
  0xdc   : > { %v269_v13 = vpop.xlane.xlu1 %268  ;;  %v267_v14 = vpop.xlane.xlu0 %266 }
  0xdd   : > { %1353 = vrsqrt.f32 %v308_v7  ;;  %v296_v15 = vmul.f32 0.0078125, %v269_v13  ;;  %v295_v16 = vmul.f32 0.0078125, %v267_v14 }
  0xde   : > { %1355 = vrsqrt.f32 %v310_v12 }
  0xdf   : > { %v312_v19 = vadd.f32 1e-05, %v296_v15  ;;  %v311_v20 = vadd.f32 1e-05, %v295_v16 }
  0xe0   : > { %v273_v21 = vpop.xlane.xlu1 %272  ;;  %v271_v22 = vpop.xlane.xlu0 %270 }
  0xe1   : > { %1357 = vrsqrt.f32 %v312_v19  ;;  %v298_v23 = vmul.f32 0.0078125, %v273_v21  ;;  %v297_v26 = vmul.f32 0.0078125, %v271_v22 }
  0xe2   : > { %1359 = vrsqrt.f32 %v311_v20 }
  0xe3   : > { %v314_v27 = vadd.f32 1e-05, %v298_v23  ;;  %v313_v28 = vadd.f32 1e-05, %v297_v26 }
  0xe4   : > { %v277_v29 = vpop.xlane.xlu1 %276  ;;  %v275_v30 = vpop.xlane.xlu0 %274 }
  0xe5   : > { %1361 = vrsqrt.f32 %v314_v27  ;;  %v300_v31 = vmul.f32 0.0078125, %v277_v29  ;;  %v299_v32 = vmul.f32 0.0078125, %v275_v30 }
  0xe6   : > { %v1350_v34 = vpop.eup %1349  ;;  %1363 = vrsqrt.f32 %v313_v28 }
  0xe7   : > { %v1352_v36 = vpop.eup %1351  ;;  %v316_v37 = vadd.f32 1e-05, %v300_v31  ;;  %v315_v38 = vadd.f32 1e-05, %v299_v32  ;;  %v339_v39 = vmul.f32 %v1350_v34, %v1707_v0 }
  0xe8   : > { %v341_v40 = vmul.f32 %v1352_v36, %v1710_v1  ;;  %v281_v41 = vpop.xlane.xlu1 %280  ;;  %v279_v42 = vpop.xlane.xlu0 %278 }
  0xe9   : > { %1365 = vrsqrt.f32 %v316_v37  ;;  %v302_v46 = vmul.f32 0.0078125, %v281_v41  ;;  %v301_v47 = vmul.f32 0.0078125, %v279_v42  ;;  %v361_v0 = vmul.f32 %v1792_v45, %v339_v39 }
  0xea   : > { %v1354_v48 = vpop.eup %1353  ;;  %1367 = vrsqrt.f32 %v315_v38  ;;  %v363_v53 = vmul.f32 %v1792_v45, %v341_v40 }
  0xeb   : > { %v1356_v49 = vpop.eup %1355  ;;  %v340_v50 = vmul.f32 %v1354_v48, %v1713_v2  ;;  %v318_v51 = vadd.f32 1e-05, %v302_v46  ;;  %v317_v52 = vadd.f32 1e-05, %v301_v47 }
  0xec   : > { %v342_v1 = vmul.f32 %v1356_v49, %v1720_v5  ;;  %v285_v54 = vpop.xlane.xlu1 %284  ;;  %v283_v56 = vpop.xlane.xlu0 %282 }
  0xed   : > { %v362_v57 = vmul.f32 %v1792_v45, %v340_v50  ;;  %1369 = vrsqrt.f32 %v318_v51  ;;  %v304_v58 = vmul.f32 0.0078125, %v285_v54  ;;  %v303_v59 = vmul.f32 0.0078125, %v283_v56 }
  0xee   : > { %v1358_v60 = vpop.eup %1357  ;;  %v364_v61 = vmul.f32 %v1792_v45, %v342_v1  ;;  %1371 = vrsqrt.f32 %v317_v52 }
  0xef   : > { %v1360_v2 = vpop.eup %1359  ;;  %v377_v62 = vpack.c.bf16 %v362_v57, %v361_v0  ;;  %v344_v63 = vmul.f32 %v1358_v60, %v1727_v8  ;;  %v320_v3 = vadd.f32 1e-05, %v304_v58  ;;  %v319_v4 = vadd.f32 1e-05, %v303_v59 }
  0xf0   : > { %v378_v5 = vpack.c.bf16 %v364_v61, %v363_v53  ;;  %v343_v6 = vmul.f32 %v1360_v2, %v1730_v9  ;;  %v289_v7 = vpop.xlane.xlu1 %288  ;;  %v287_v12 = vpop.xlane.xlu0 %286 }
  0xf1   : > { %578 = vmatmul.mubr.bf16.vlgmr.msra.gmra.mxu0 %v377_v62  ;;  %1202 = vmatprep.mubr.bf16.mxu1 %v377_v62  ;;  %v366_v13 = vmul.f32 %v1792_v45, %v344_v63  ;;  %1373 = vrsqrt.f32 %v320_v3  ;;  %v306_v14 = vmul.f32 0.0078125, %v289_v7  ;;  %v305_v15 = vmul.f32 0.0078125, %v287_v12 }
  0xf2   : > { %v1362_v16 = vpop.eup %1361  ;;  %1203 = vmatmul.mubr.bf16.vlgmr.msra.gmra.mxu1 %v378_v5  ;;  %587 = vmatprep.mubr.bf16.mxu0 %v1543_v55  ;;  %v365_v8 = vmul.f32 %v1792_v45, %v343_v6  ;;  %1375 = vrsqrt.f32 %v319_v4 }
  0xf3   : > { %v1364_v19 = vpop.eup %1363  ;;  %v346_v20 = vmul.f32 %v1362_v16, %v1733_v10  ;;  %v322_v9 = vadd.f32 1e-05, %v306_v14  ;;  %v321_v21 = vadd.f32 1e-05, %v305_v15 }
  0xf4   : > { %v379_v22 = vpack.c.bf16 %v366_v13, %v365_v8  ;;  %v345_v23 = vmul.f32 %v1364_v19, %v1736_v11 }
  0xf5   : > { %v368_v26 = vmul.f32 %v1792_v45, %v346_v20  ;;  %1377 = vrsqrt.f32 %v322_v9 }
  0xf6   : > { %v1366_v27 = vpop.eup %1365  ;;  %1206 = vmatprep.mubr.bf16.mxu1 %v379_v22  ;;  %v367_v28 = vmul.f32 %v1792_v45, %v345_v23  ;;  %1379 = vrsqrt.f32 %v321_v21 }
  0xf7   : > { %v1368_v29 = vpop.eup %1367  ;;  %v348_v30 = vmul.f32 %v1366_v27, %v1743_v17 }
  0xf8   : > { %v380_v31 = vpack.c.bf16 %v368_v26, %v367_v28  ;;  %v347_v32 = vmul.f32 %v1368_v29, %v1746_v18 }
  0xf9   : > { %588 = vmatmul.mubr.bf16.gmra.mxu0 %v378_v5  ;;  %v370_v10 = vmul.f32 %v1792_v45, %v348_v30 }
  0xfa   : > { %v1370_v34 = vpop.eup %1369  ;;  %597 = vmatprep.mubr.bf16.mxu0 %v1543_v55  ;;  %1207 = vmatmul.mubr.bf16.gmra.mxu1 %v380_v31  ;;  %v369_v11 = vmul.f32 %v1792_v45, %v347_v32 }
  0xfb   : > { %v1372_v36 = vpop.eup %1371  ;;  %v350_v37 = vmul.f32 %v1370_v34, %v1753_v24 }
  0xfc   : > { %v381_v38 = vpack.c.bf16 %v370_v10, %v369_v11  ;;  %v349_v39 = vmul.f32 %v1372_v36, %v1756_v25 }
  0xfd   : > { %v372_v17 = vmul.f32 %v1792_v45, %v350_v37 }
  0xfe   : > { %v1374_v40 = vpop.eup %1373  ;;  %1210 = vmatprep.mubr.bf16.mxu1 %v381_v38  ;;  %v371_v18 = vmul.f32 %v1792_v45, %v349_v39 }
  0xff   : > { %v1376_v41 = vpop.eup %1375  ;;  %v352_v42 = vmul.f32 %v1374_v40, %v1767_v33 }
 0x100   : > { %v382_v46 = vpack.c.bf16 %v372_v17, %v371_v18  ;;  %v351_v47 = vmul.f32 %v1376_v41, %v1770_v35 }
 0x101   : > { %598 = vmatmul.mubr.bf16.gmra.mxu0 %v379_v22  ;;  %v374_v48 = vmul.f32 %v1792_v45, %v352_v42 }
 0x102   : > { %v1378_v49 = vpop.eup %1377  ;;  %607 = vmatprep.mubr.bf16.mxu0 %v1543_v55  ;;  %1211 = vmatmul.mubr.bf16.gmra.mxu1 %v382_v46  ;;  %v373_v24 = vmul.f32 %v1792_v45, %v351_v47 }
 0x103   : > { %v1380_v25 = vpop.eup %1379  ;;  %v354_v50 = vmul.f32 %v1378_v49, %v1777_v43 }
 0x104   : > { %v383_v51 = vpack.c.bf16 %v374_v48, %v373_v24  ;;  %v353_v52 = vmul.f32 %v1380_v25, %v1780_v44 }
 0x105   : > { %v376_v33 = vmul.f32 %v1792_v45, %v354_v50 }
 0x106   : > { %1214 = vmatprep.mubr.bf16.mxu1 %v383_v51  ;;  %v375_v35 = vmul.f32 %v1792_v45, %v353_v52 }
 0x108   : > { %v384_v0 = vpack.c.bf16 %v376_v33, %v375_v35 }
 0x109   : > { %608 = vmatmul.mubr.bf16.gmra.mxu0 %v380_v31 }
 0x10a   : > { %617 = vmatprep.mubr.bf16.mxu0 %v1543_v55  ;;  %1215 = vmatmul.mubr.bf16.gmra.mxu1 %v384_v0 }
 0x111   : > { %618 = vmatmul.mubr.bf16.gmra.mxu0 %v381_v38 }
 0x112   : > { %627 = vmatprep.mubr.bf16.mxu0 %v1543_v55 }
 0x119   : > { %628 = vmatmul.mubr.bf16.gmra.mxu0 %v382_v46 }
 0x11a   : > { %637 = vmatprep.mubr.bf16.mxu0 %v1543_v55 }
 0x121   : > { %638 = vmatmul.mubr.bf16.gmra.mxu0 %v383_v51 }
 0x122   : > { %647 = vmatprep.mubr.bf16.mxu0 %v1543_v55 }
 0x129   : > { %648 = vmatmul.mubr.bf16.gmra.mxu0 %v384_v0 }
 0x1b1   : > { %v579_v43 = vpop.f32.mrf.mxu0 }
 0x1b2   : > { %v1204_v44 = vpop.f32.mrf.mxu1 }
 0x1b3   : > { %v1143_v1 = vpack.c.bf16 %v1204_v44, %v1204_v44  ;;  %v581_v45 = vpop.f32.mrf.mxu0 }
 0x1b4   : > { %v1138_v53 = vpack.c.bf16 %v581_v45, %v579_v43  ;;  %v692_v54 = vpop.f32.mrf.mxu1 }
 0x1b5   : > { %920 = vst [vmem:[%s1832_s26 + $0x20] sm:$0xf] %v1143_v1  ;;  %v1139_v56 = vpack.c.bf16 %v692_v54, %v692_v54  ;;  %v583_v57 = vpop.f32.mrf.mxu0 }
 0x1b6   : > { %915 = vst [vmem:[%s1832_s26] sm:$0xff] %v1138_v53  ;;  %v1205_v55 = vpop.f32.mrf.mxu1 }
 0x1b7   : > { %916 = vst [vmem:[%s1832_s26 + $0x8] sm:$0xf] %v1139_v56  ;;  %v1145_v58 = vpack.c.bf16 %v1205_v55, %v1205_v55  ;;  %v585_v59 = vpop.f32.mrf.mxu0 }
 0x1b8   : > { %v1140_v60 = vpack.c.bf16 %v585_v59, %v583_v57  ;;  %v695_v61 = vpop.f32.mrf.mxu1 }
 0x1b9   : > { %922 = vst [vmem:[%s1832_s26 + $0x2c] sm:$0xf] %v1145_v58  ;;  %v1141_v2 = vpack.c.bf16 %v695_v61, %v695_v61  ;;  %v589_v62 = vpop.f32.mrf.mxu0 }
 0x1ba   : > { %917 = vst [vmem:[%s1832_s26 + $0xc] sm:$0xff] %v1140_v60  ;;  %v1208_v63 = vpop.f32.mrf.mxu1 }
 0x1bb   : > { %918 = vst [vmem:[%s1832_s26 + $0x14] sm:$0xf] %v1141_v2  ;;  %v591_v3 = vpop.f32.mrf.mxu0  ;;  %v1151_v4 = vpack.c.bf16 %v1208_v63, %v1208_v63 }
 0x1bc   : > { %v1142_v5 = vpack.c.bf16 %v591_v3, %v589_v62  ;;  %v708_v6 = vpop.f32.mrf.mxu1 }
 0x1bd   : > { %v593_v7 = vpop.f32.mrf.mxu0  ;;  %928 = vst [vmem:[%s1832_s26 + $0x50] sm:$0xf] %v1151_v4  ;;  %v1147_v12 = vpack.c.bf16 %v708_v6, %v708_v6 }
 0x1be   : > { %919 = vst [vmem:[%s1832_s26 + $0x18] sm:$0xff] %v1142_v5  ;;  %v1209_v13 = vpop.f32.mrf.mxu1 }
 0x1bf   : > { %v595_v14 = vpop.f32.mrf.mxu0  ;;  %924 = vst [vmem:[%s1832_s26 + $0x38] sm:$0xf] %v1147_v12  ;;  %v1153_v15 = vpack.c.bf16 %v1209_v13, %v1209_v13 }
 0x1c0   : > { %v1144_v16 = vpack.c.bf16 %v595_v14, %v593_v7  ;;  %v711_v8 = vpop.f32.mrf.mxu1 }
 0x1c1   : > { %v599_v19 = vpop.f32.mrf.mxu0  ;;  %930 = vst [vmem:[%s1832_s26 + $0x5c] sm:$0xf] %v1153_v15  ;;  %v1149_v20 = vpack.c.bf16 %v711_v8, %v711_v8 }
 0x1c2   : > { %921 = vst [vmem:[%s1832_s26 + $0x24] sm:$0xff] %v1144_v16  ;;  %v1212_v9 = vpop.f32.mrf.mxu1 }
 0x1c3   : > { %v601_v21 = vpop.f32.mrf.mxu0  ;;  %926 = vst [vmem:[%s1832_s26 + $0x44] sm:$0xf] %v1149_v20  ;;  %v1159_v22 = vpack.c.bf16 %v1212_v9, %v1212_v9 }
 0x1c4   : > { %v1146_v23 = vpack.c.bf16 %v601_v21, %v599_v19  ;;  %v724_v26 = vpop.f32.mrf.mxu1 }
 0x1c5   : > { %v603_v27 = vpop.f32.mrf.mxu0  ;;  %936 = vst [vmem:[%s1832_s26 + $0x80] sm:$0xf] %v1159_v22  ;;  %v1155_v28 = vpack.c.bf16 %v724_v26, %v724_v26 }
 0x1c6   : > { %923 = vst [vmem:[%s1832_s26 + $0x30] sm:$0xff] %v1146_v23  ;;  %v1213_v29 = vpop.f32.mrf.mxu1 }
 0x1c7   : > { %v605_v30 = vpop.f32.mrf.mxu0  ;;  %932 = vst [vmem:[%s1832_s26 + $0x68] sm:$0xf] %v1155_v28  ;;  %v1161_v31 = vpack.c.bf16 %v1213_v29, %v1213_v29 }
 0x1c8   : > { %v1148_v32 = vpack.c.bf16 %v605_v30, %v603_v27  ;;  %v727_v10 = vpop.f32.mrf.mxu1 }
 0x1c9   : > { %v609_v34 = vpop.f32.mrf.mxu0  ;;  %938 = vst [vmem:[%s1832_s26 + $0x8c] sm:$0xf] %v1161_v31  ;;  %v1157_v11 = vpack.c.bf16 %v727_v10, %v727_v10 }
 0x1ca   : > { %925 = vst [vmem:[%s1832_s26 + $0x3c] sm:$0xff] %v1148_v32  ;;  %v1216_v36 = vpop.f32.mrf.mxu1 }
 0x1cb   : > { %v611_v37 = vpop.f32.mrf.mxu0  ;;  %934 = vst [vmem:[%s1832_s26 + $0x74] sm:$0xf] %v1157_v11  ;;  %v1167_v38 = vpack.c.bf16 %v1216_v36, %v1216_v36 }
 0x1cc   : > { %v1150_v39 = vpack.c.bf16 %v611_v37, %v609_v34  ;;  %v740_v17 = vpop.f32.mrf.mxu1 }
 0x1cd   : > { %v613_v40 = vpop.f32.mrf.mxu0  ;;  %944 = vst [vmem:[%s1832_s26 + $0xb0] sm:$0xf] %v1167_v38  ;;  %v1163_v18 = vpack.c.bf16 %v740_v17, %v740_v17 }
 0x1ce   : > { %927 = vst [vmem:[%s1832_s26 + $0x48] sm:$0xff] %v1150_v39  ;;  %v1217_v41 = vpop.f32.mrf.mxu1 }
 0x1cf   : > { %v615_v42 = vpop.f32.mrf.mxu0  ;;  %940 = vst [vmem:[%s1832_s26 + $0x98] sm:$0xf] %v1163_v18  ;;  %v1169_v46 = vpack.c.bf16 %v1217_v41, %v1217_v41 }
 0x1d0   : > { %v1152_v47 = vpack.c.bf16 %v615_v42, %v613_v40  ;;  %v743_v48 = vpop.f32.mrf.mxu1 }
 0x1d1   : > { %v619_v49 = vpop.f32.mrf.mxu0  ;;  %946 = vst [vmem:[%s1832_s26 + $0xbc] sm:$0xf] %v1169_v46  ;;  %v1165_v24 = vpack.c.bf16 %v743_v48, %v743_v48 }
 0x1d2   : > { %929 = vst [vmem:[%s1832_s26 + $0x54] sm:$0xff] %v1152_v47 }
 0x1d3   : > { %v621_v25 = vpop.f32.mrf.mxu0  ;;  %942 = vst [vmem:[%s1832_s26 + $0xa4] sm:$0xf] %v1165_v24 }
 0x1d4   : > { %v1154_v50 = vpack.c.bf16 %v621_v25, %v619_v49 }
 0x1d5   : > { %v623_v51 = vpop.f32.mrf.mxu0 }
 0x1d6   : > { %931 = vst [vmem:[%s1832_s26 + $0x60] sm:$0xff] %v1154_v50 }
 0x1d7   : > { %v625_v52 = vpop.f32.mrf.mxu0 }
 0x1d8   : > { %v1156_v33 = vpack.c.bf16 %v625_v52, %v623_v51 }
 0x1d9   : > { %v629_v35 = vpop.f32.mrf.mxu0 }
 0x1da   : > { %933 = vst [vmem:[%s1832_s26 + $0x6c] sm:$0xff] %v1156_v33 }
 0x1db   : > { %v631_v0 = vpop.f32.mrf.mxu0 }
 0x1dc   : > { %v1158_v43 = vpack.c.bf16 %v631_v0, %v629_v35 }
 0x1dd   : > { %v633_v44 = vpop.f32.mrf.mxu0 }
 0x1de   : > { %935 = vst [vmem:[%s1832_s26 + $0x78] sm:$0xff] %v1158_v43 }
 0x1df   : > { %v635_v1 = vpop.f32.mrf.mxu0 }
 0x1e0   : > { %v1160_v45 = vpack.c.bf16 %v635_v1, %v633_v44 }
 0x1e1   : > { %v639_v53 = vpop.f32.mrf.mxu0 }
 0x1e2   : > { %937 = vst [vmem:[%s1832_s26 + $0x84] sm:$0xff] %v1160_v45 }
 0x1e3   : > { %v641_v54 = vpop.f32.mrf.mxu0 }
 0x1e4   : > { %v1162_v56 = vpack.c.bf16 %v641_v54, %v639_v53 }
 0x1e5   : > { %v643_v57 = vpop.f32.mrf.mxu0 }
 0x1e6   : > { %939 = vst [vmem:[%s1832_s26 + $0x90] sm:$0xff] %v1162_v56 }
 0x1e7   : > { %v645_v55 = vpop.f32.mrf.mxu0 }
 0x1e8   : > { %v1164_v58 = vpack.c.bf16 %v645_v55, %v643_v57 }
 0x1e9   : > { %v649_v59 = vpop.f32.mrf.mxu0 }
 0x1ea   : > { %941 = vst [vmem:[%s1832_s26 + $0x9c] sm:$0xff] %v1164_v58 }
 0x1eb   : > { %v651_v60 = vpop.f32.mrf.mxu0 }
 0x1ec   : > { %v1166_v61 = vpack.c.bf16 %v651_v60, %v649_v59 }
 0x1ed   : > { %v653_v2 = vpop.f32.mrf.mxu0 }
 0x1ee   : > { %943 = vst [vmem:[%s1832_s26 + $0xa8] sm:$0xff] %v1166_v61 }
 0x1ef   : > { %v655_v62 = vpop.f32.mrf.mxu0 }
 0x1f0   : > { %v1168_v63 = vpack.c.bf16 %v655_v62, %v653_v2 }
 0x1f2   : > { %945 = vst [vmem:[%s1832_s26 + $0xb4] sm:$0xff] %v1168_v63 }
 0x1f3   : > { %1448 = shalt.err (!%p1445_p5)
}
 0x1f4   : > { %s1449_s7 = scalar_lea.hbm %s1871_s16, 3072  ;;  %s1453_s22 = scalar_lea.hbm %s1930_s3, 12288 }
 0x1f5   : > { %p1450_p4 = scmp.ne.s32.totalorder %s1871_s16, %s1449_s7  ;;  %p1454_p9 = scmp.lt.s32.totalorder %s1871_s16, %s1930_s3 }
 0x1f6   : > { %p1455_p10 = scmp.lt.s32.totalorder %s1453_s22, %s1449_s7 }
 0x1f7   : > { %p1451_p6 = pnand %p1450_p4, %p1655_p11 }
 0x1f8   : > { %p1456_p12 = por %p1455_p10, %p1454_p9 }
 0x1f9   : > { %p1452_p7 = pneg %p1451_p6 }
 0x1fb   : > { %p1457_p1 = pnand %p1456_p12, %p1452_p7 }
 0x1fd   : > { %1460 = shalt.err (!%p1457_p1)
}
 0x1fe   : > { %s1545_s26 = smov 192   ;;  %s1546_s23 = smov 12  }
 0x1ff   : > { %1227 = dma.vmem_to_hbm [thread:$0]  (%p1655_p11), %s1873_s28, 3072, %s1871_s16, %s948_s9, %s1545_s26, %s1545_s26, %s1546_s23  }
 0x200 PF: > { %s1951_s4 = sld [smem:[#allocation11_spill]]  ;;  %p1244_p8 = scmp.ge.s32.totalorder %s1535_s19, 2 }
 0x201   : > { %s1952_s5 = sld [smem:[#allocation13_spill]] }
 0x206   : > { %s979_s10 = sand.u32 1, %s1951_s4  }
 0x207   : > { %p1953_p13 = scmp.ne.s32.totalorder %s1952_s5, 0  ;;  %s980_s29 = scalar_lea.sflag [#allocation4], %s979_s10 }
 0x209   : > { %p1238_p2 = pnand %p1244_p8, %p1953_p13 }
 0x20b   : > { %p1239_p0 = pneg %p1238_p2 }
 0x20d   : > { %1502 = dma.done.wait (%p1239_p0), %s980_s29, 3072  }
 0x20e   : > { %1504 = vsyncadd (%p1239_p0), %s980_s29, 4294964224  ;;  %s20_s19 = sadd.s32 1, %s1535_s19   ;;  %s1954_s15 = sld [smem:[#allocation12_spill]] }
 0x20f   : > { %p17_p3 = scmp.ge.s32.totalorder %s20_s19, 6   ;;  %s1955_s17 = sld [smem:[#allocation14_spill]] }
 0x210   : > { %s1956_s12 = smov %s1511_s13  ;;  %s1957_s13 = smov %s1515_s14 }
 0x211   : > { %s1958_s14 = smov %s1672_s6  ;;  %s1959_s16 = smov %s1531_s18 }
 0x212   : > { %s1960_s18 = smov %s1966_s8  ;;  %19 = sbr.rel (!%p17_p3) target bundleno = 10 (0xa), region = 81 }
 0x217   :  { %985 = vsyncpa [#allocation3], 1 }
 0x218   :  { %987 = vsyncpa [#allocation3 + $0x1], 1 }
 0x219   :  { %988 = vsyncpa [#allocation6], 1 }
 0x21a   :  { %989 = vsyncpa [#allocation4], 1 }
 0x21b   :  { %991 = vsyncpa [#allocation4 + $0x1], 1 }

</bundles_post_ra>
